<compile_context>
chip_gen: v7x
topology: tpu7x:2x2x1
jax: 0.10.0
libtpu: 0.0.40
codegen_flags: <defaults>
</compile_context>

<pallas_src>
import functools

import jax
import jax.numpy as jnp
from jax.experimental import pallas as pl
from jax.experimental.pallas import tpu as pltpu


# Scoped-VMEM budget with headroom for v7x's 64 MiB physical VMEM
# (v5e/v6e have 128 MiB so this is always safe).
_VMEM_LIMIT_BYTES = 48 * 1024 * 1024


def _pick_tile(total, cap=128):
    """Largest tile <= cap that divides `total` and is sublane friendly."""
    for t in range(min(total, cap), 0, -1):
        if total % t == 0 and (t % 8 == 0 or t == total):
            return t
    return total


def _const_spec(shape):
    """Full-array block that stays VMEM resident across all grid steps."""
    zeros = (0,) * len(shape)
    return pl.BlockSpec(shape, lambda *_: zeros)


# ---------------------------------------------------------------------------
# Kernel 1: VisTransformLayer (fc6 -> relu -> fc7 -> relu -> fc8)
# ---------------------------------------------------------------------------

def _feat_kernel(x_ref, w6_ref, b6_ref, w7_ref, b7_ref, w8_ref, b8_ref, o_ref):
    """x_ref: (tr, F) flattened batch-major rows; o_ref: (tr, D) fc8 features."""
    f32, bf16 = jnp.float32, jnp.bfloat16
    x = x_ref[...].astype(bf16)
    h = jnp.dot(x, w6_ref[...], preferred_element_type=f32) + b6_ref[...]
    h = jnp.maximum(h, 0.0)                                   # relu6 (dropout == id)
    h = jnp.dot(h.astype(bf16), w7_ref[...], preferred_element_type=f32) + b7_ref[...]
    h = jnp.maximum(h, 0.0)                                   # relu7 (dropout == id)
    h = jnp.dot(h.astype(bf16), w8_ref[...], preferred_element_type=f32) + b8_ref[...]
    o_ref[...] = h.astype(o_ref.dtype)


# ---------------------------------------------------------------------------
# Kernel 2: fused dual-GRU recurrence, batched over N on sublanes
# ---------------------------------------------------------------------------

def _gru_gates(xg, hg, h_prev, hidden):
    """PyTorch GRU gate math (order r, z, n; b_hh lives inside the r-gated term)."""
    r = jax.nn.sigmoid(xg[:, :hidden] + hg[:, :hidden])
    z = jax.nn.sigmoid(xg[:, hidden:2 * hidden] + hg[:, hidden:2 * hidden])
    n = jnp.tanh(xg[:, 2 * hidden:] + r * hg[:, 2 * hidden:])
    return (1.0 - z) * n + z * h_prev


def _dual_gru_kernel(x_ref, wih_ref, bih_ref, whp_ref, bhp_ref, whc_ref, bhc_ref,
                     hout_ref, h_state):
    """One time-chunk of both recurrences.

    x_ref    : (tc, N, D)  time-major fc8 features for this chunk
    hout_ref : (tc, N, 2H) [h_prop | h_cls] per step
    h_state  : (N, 2H) f32 VMEM scratch, persists across grid steps (chunks)
    """
    f32, bf16 = jnp.float32, jnp.bfloat16
    tc = x_ref.shape[0]
    H = whp_ref.shape[0]
    H3 = 3 * H

    @pl.when(pl.program_id(0) == 0)
    def _():                                                  # init_hidden_state: zeros
        h_state[...] = jnp.zeros_like(h_state)

    def step(j, h):                                           # h: (N, 2H) f32
        x_t = x_ref[pl.ds(j, 1)][0].astype(bf16)              # (N, D)
        # One matmul feeds the input projections of BOTH branches.
        xg = jnp.dot(x_t, wih_ref[...], preferred_element_type=f32) + bih_ref[...]
        hp, hc = h[:, :H], h[:, H:]
        hgp = jnp.dot(hp.astype(bf16), whp_ref[...],
                      preferred_element_type=f32) + bhp_ref[...]   # (N, 3H)
        hgc = jnp.dot(hc.astype(bf16), whc_ref[...],
                      preferred_element_type=f32) + bhc_ref[...]   # (N, 3H)
        hp_new = _gru_gates(xg[:, :H3], hgp, hp, H)
        hc_new = _gru_gates(xg[:, H3:], hgc, hc, H)
        h_new = jnp.concatenate([hp_new, hc_new], axis=1)     # (N, 2H)
        hout_ref[pl.ds(j, 1)] = h_new[None].astype(hout_ref.dtype)
        return h_new

    h_last = jax.lax.fori_loop(0, tc, step, h_state[...])
    h_state[...] = h_last                                     # carry across chunks


# ---------------------------------------------------------------------------
# Kernel 3: fused output heads + class-group softmax
# ---------------------------------------------------------------------------

def _heads_kernel(h_ref, wp_ref, bp_ref, wc_ref, bc_ref, wj_ref, bj_ref,
                  g_ref, gt_ref,
                  prop_ref, cls_ref, joint_ref, scores_ref):
    """h_ref: (1, tl, 2H) = [h_prop | h_cls] rows of one batch element.
    Writes proposal scores, class logits, joint logits and the already
    softmaxed joint class scores for those rows, in batch order."""
    f32 = jnp.float32
    H = wp_ref.shape[0]
    h = h_ref[0].astype(jnp.bfloat16)                         # (tl, 2H)
    hp = h[:, :H]
    hc = h[:, H:]

    prop = jax.nn.sigmoid(
        jnp.dot(hp, wp_ref[...], preferred_element_type=f32) + bp_ref[...])
    cls_logits = jnp.dot(hc, wc_ref[...], preferred_element_type=f32) + bc_ref[...]
    # joint head uses the full [h_prop | h_cls] row -> no concat materialized.
    joint = jnp.dot(h, wj_ref[...], preferred_element_type=f32) + bj_ref[...]  # (tl, K*C)

    # Grouped softmax over each C-wide class block, fused, without in-kernel
    # reshapes: subtracting the row-wide max is an exact per-group stabiliser,
    # and per-group sums / their broadcast back to K*C lanes are two small f32
    # matmuls against a constant 0/1 group-membership matrix.
    m = jnp.max(joint, axis=-1, keepdims=True)
    e = jnp.exp(joint - m)
    gsum = jnp.dot(e, g_ref[...], preferred_element_type=f32)        # (tl, K)
    denom = jnp.dot(gsum, gt_ref[...], preferred_element_type=f32)   # (tl, K*C)
    scores = e / denom

    prop_ref[0] = prop.astype(prop_ref.dtype)
    cls_ref[0] = cls_logits.astype(cls_ref.dtype)
    joint_ref[0] = joint.astype(joint_ref.dtype)
    scores_ref[0] = scores.astype(scores_ref.dtype)


# ---------------------------------------------------------------------------
# Parameter construction (deterministic, synthetic)
# ---------------------------------------------------------------------------

def _uniform(key, shape, scale):
    return jax.random.uniform(key, shape, jnp.float32, -scale, scale)


def init_params(key, *, pool_in, d_mid, input_size, h_width, num_proposals,
                num_classes):
    keys = jax.random.split(key, 24)
    ki = iter(keys)
    H = h_width
    p = {}
    # VisTransformLayer
    p["fc6_w"] = _uniform(next(ki), (pool_in, d_mid), 1.0 / jnp.sqrt(pool_in))
    p["fc6_b"] = _uniform(next(ki), (d_mid,), 1.0 / jnp.sqrt(pool_in))
    p["fc7_w"] = _uniform(next(ki), (d_mid, d_mid), 1.0 / jnp.sqrt(d_mid))
    p["fc7_b"] = _uniform(next(ki), (d_mid,), 1.0 / jnp.sqrt(d_mid))
    p["fc8_w"] = _uniform(next(ki), (d_mid, input_size), 1.0 / jnp.sqrt(d_mid))
    p["fc8_b"] = _uniform(next(ki), (input_size,), 1.0 / jnp.sqrt(d_mid))
    # Two single-layer GRUs (gate order r, z, n), weights stored transposed.
    gs = 1.0 / jnp.sqrt(H)
    for name in ("prop", "cls"):
        p[f"{name}_wih_t"] = _uniform(next(ki), (input_size, 3 * H), gs)
        p[f"{name}_bih"] = _uniform(next(ki), (3 * H,), gs)
        p[f"{name}_whh_t"] = _uniform(next(ki), (H, 3 * H), gs)
        p[f"{name}_bhh"] = _uniform(next(ki), (3 * H,), gs)
    # Output heads
    p["prop_lin_w"] = _uniform(next(ki), (H, num_proposals), gs)
    p["prop_lin_b"] = _uniform(next(ki), (num_proposals,), gs)
    p["cls_lin_w"] = _uniform(next(ki), (H, num_classes), gs)
    p["cls_lin_b"] = _uniform(next(ki), (num_classes,), gs)
    p["joint_w"] = _uniform(next(ki), (2 * H, num_proposals * num_classes),
                            1.0 / jnp.sqrt(2 * H))
    p["joint_b"] = _uniform(next(ki), (num_proposals * num_classes,),
                            1.0 / jnp.sqrt(2 * H))
    return p


# ---------------------------------------------------------------------------
# Full forward pass
# ---------------------------------------------------------------------------

def sst_ad_prerel_forward(params, inputs, *, num_proposals, num_classes):
    N, L, F = inputs.shape
    H = params["prop_whh_t"].shape[0]
    K, C = num_proposals, num_classes
    Dm = params["fc6_w"].shape[1]
    D = params["fc8_w"].shape[1]
    H2, H3, H6 = 2 * H, 3 * H, 6 * H
    KC = K * C
    f32, bf16 = jnp.float32, jnp.bfloat16

    def cp(sem):
        return pltpu.CompilerParams(dimension_semantics=sem,
                                    vmem_limit_bytes=_VMEM_LIMIT_BYTES)

    # ---- kernel 1: VisTransformLayer on flattened (N*L, F) rows -------------
    R = N * L
    tr = _pick_tile(R, cap=256)
    feats = pl.pallas_call(
        _feat_kernel,
        out_shape=jax.ShapeDtypeStruct((R, D), bf16),
        grid=(R // tr,),
        in_specs=[
            pl.BlockSpec((tr, F), lambda r: (r, 0)),
            _const_spec((F, Dm)), _const_spec((1, Dm)),
            _const_spec((Dm, Dm)), _const_spec((1, Dm)),
            _const_spec((Dm, D)), _const_spec((1, D)),
        ],
        out_specs=pl.BlockSpec((tr, D), lambda r: (r, 0)),
        compiler_params=cp(("parallel",)),
    )(inputs.reshape(R, F),
      params["fc6_w"].astype(bf16), params["fc6_b"].reshape(1, Dm),
      params["fc7_w"].astype(bf16), params["fc7_b"].reshape(1, Dm),
      params["fc8_w"].astype(bf16), params["fc8_b"].reshape(1, D))

    # (N, L, D) -> (L, N, D): the module's torch.transpose(inputs, 0, 1), done
    # on the narrow D-wide fc8 features (not the 6H-wide gate projections) so
    # the XLA transpose stays cheap, and every GRU step becomes a clean (N, D)
    # sublane tile for batched matmuls.
    feats_tm = jnp.transpose(feats.reshape(N, L, D), (1, 0, 2))

    # Combined GRU input-projection weights: one matmul feeds both branches.
    wih = jnp.concatenate([params["prop_wih_t"], params["cls_wih_t"]], axis=1)
    bih = jnp.concatenate([params["prop_bih"], params["cls_bih"]]).reshape(1, H6)

    # ---- kernel 2: fused dual-GRU recurrence, streamed in time chunks -------
    tc = _pick_tile(L, cap=128)
    hcomb_tm = pl.pallas_call(
        _dual_gru_kernel,
        out_shape=jax.ShapeDtypeStruct((L, N, H2), f32),
        grid=(L // tc,),
        in_specs=[
            pl.BlockSpec((tc, N, D), lambda lc: (lc, 0, 0)),
            _const_spec((D, H6)), _const_spec((1, H6)),
            _const_spec((H, H3)), _const_spec((1, H3)),
            _const_spec((H, H3)), _const_spec((1, H3)),
        ],
        out_specs=pl.BlockSpec((tc, N, H2), lambda lc: (lc, 0, 0)),
        scratch_shapes=[pltpu.VMEM((N, H2), f32)],
        compiler_params=cp(("arbitrary",)),
    )(feats_tm,
      wih.astype(bf16), bih,
      params["prop_whh_t"].astype(bf16), params["prop_bhh"].reshape(1, H3),
      params["cls_whh_t"].astype(bf16), params["cls_bhh"].reshape(1, H3))

    # (L, N, 2H) -> (N, L, 2H): back to batch order so the head kernel writes
    # the module's batch-major outputs directly (small tensor, XLA transpose).
    hcomb_bm = jnp.transpose(hcomb_tm, (1, 0, 2))

    # ---- kernel 3: fused output heads + class-group softmax -----------------
    tl = _pick_tile(L, cap=128)
    grp = jnp.repeat(jnp.arange(K), C)                               # (K*C,)
    gmat = (grp[:, None] == jnp.arange(K)[None, :]).astype(f32)      # (K*C, K)

    prop3, cls3, joint3, scores3 = pl.pallas_call(
        _heads_kernel,
        out_shape=(
            jax.ShapeDtypeStruct((N, L, K), f32),
            jax.ShapeDtypeStruct((N, L, C), f32),
            jax.ShapeDtypeStruct((N, L, KC), f32),
            jax.ShapeDtypeStruct((N, L, KC), f32),
        ),
        grid=(N, L // tl),
        in_specs=[
            pl.BlockSpec((1, tl, H2), lambda n, l: (n, l, 0)),
            _const_spec((H, K)), _const_spec((1, K)),
            _const_spec((H, C)), _const_spec((1, C)),
            _const_spec((H2, KC)), _const_spec((1, KC)),
            _const_spec((KC, K)), _const_spec((K, KC)),
        ],
        out_specs=(
            pl.BlockSpec((1, tl, K), lambda n, l: (n, l, 0)),
            pl.BlockSpec((1, tl, C), lambda n, l: (n, l, 0)),
            pl.BlockSpec((1, tl, KC), lambda n, l: (n, l, 0)),
            pl.BlockSpec((1, tl, KC), lambda n, l: (n, l, 0)),
        ),
        compiler_params=cp(("parallel", "parallel")),
    )(hcomb_bm,
      params["prop_lin_w"].astype(bf16), params["prop_lin_b"].reshape(1, K),
      params["cls_lin_w"].astype(bf16), params["cls_lin_b"].reshape(1, C),
      params["joint_w"].astype(bf16), params["joint_b"].reshape(1, KC),
      gmat, gmat.T)

    proposals_out = prop3                                  # (N, L, K)
    class_out = cls3.reshape(N * L, C)                     # (N*L, C) batch order
    output = joint3.reshape(N * L * K, C)                  # batch-order joint logits
    final_joint_cls_scores = scores3.reshape(N, L, K, C)
    return output, proposals_out, class_out, final_joint_cls_scores


# ---------------------------------------------------------------------------
# Demo
# ---------------------------------------------------------------------------

if __name__ == "__main__":
    # Small, module-consistent (and lane-friendly) shapes.
    N, L = 2, 8                 # batch, sequence length
    POOL_IN = 512               # 3072 in the original module
    D_MID = 256                 # 1024
    INPUT_SIZE = 128            # 500
    H_WIDTH = 128               # 512
    NUM_PROPOSALS = 16
    NUM_CLASSES = 21

    key = jax.random.PRNGKey(0)
    pkey, xkey = jax.random.split(key)

    params = init_params(
        pkey, pool_in=POOL_IN, d_mid=D_MID, input_size=INPUT_SIZE,
        h_width=H_WIDTH, num_proposals=NUM_PROPOSALS, num_classes=NUM_CLASSES)
    inputs = jax.random.normal(xkey, (N, L, POOL_IN), jnp.float32)

    fwd = jax.jit(functools.partial(
        sst_ad_prerel_forward,
        num_proposals=NUM_PROPOSALS, num_classes=NUM_CLASSES))
    output, proposals_out, class_out, joint_scores = fwd(params, inputs)
    jax.block_until_ready((output, proposals_out, class_out, joint_scores))

    assert output.shape == (N * L * NUM_PROPOSALS, NUM_CLASSES)
    assert proposals_out.shape == (N, L, NUM_PROPOSALS)
    assert class_out.shape == (N * L, NUM_CLASSES)
    assert joint_scores.shape == (N, L, NUM_PROPOSALS, NUM_CLASSES)
    assert bool(jnp.all(jnp.isfinite(output)))
    assert bool(jnp.all((proposals_out >= 0.0) & (proposals_out <= 1.0)))
    assert bool(jnp.allclose(jnp.sum(joint_scores, axis=-1), 1.0, atol=1e-5))

    print("KERNEL_OK")
</pallas_src>

<mosaic_0001>
module attributes {stable_mosaic.version = 11 : i64} {
  func.func @_feat_kernel(%arg0: i32, %arg1: memref<16x512xf32, #tpu.memory_space<vmem>>, %arg2: memref<512x256xbf16, #tpu.memory_space<vmem>>, %arg3: memref<1x256xf32, #tpu.memory_space<vmem>>, %arg4: memref<256x256xbf16, #tpu.memory_space<vmem>>, %arg5: memref<1x256xf32, #tpu.memory_space<vmem>>, %arg6: memref<256x128xbf16, #tpu.memory_space<vmem>>, %arg7: memref<1x128xf32, #tpu.memory_space<vmem>>, %arg8: memref<16x128xbf16, #tpu.memory_space<vmem>>) attributes {dimension_semantics = [#tpu.dimension_semantics<parallel>], iteration_bounds = array<i64: 1>, scalar_prefetch = 0 : i64, scratch_operands = 0 : i64, tpu.core_type = #tpu.core_type<tc>, window_params = [{transform_indices = @transform_0, window_bounds = array<i64: 16, 512>}, {pipeline_mode = #tpu.pipeline_mode<synchronous>, transform_indices = @transform_1, window_bounds = array<i64: 512, 256>}, {pipeline_mode = #tpu.pipeline_mode<synchronous>, transform_indices = @transform_2, window_bounds = array<i64: 1, 256>}, {pipeline_mode = #tpu.pipeline_mode<synchronous>, transform_indices = @transform_3, window_bounds = array<i64: 256, 256>}, {pipeline_mode = #tpu.pipeline_mode<synchronous>, transform_indices = @transform_4, window_bounds = array<i64: 1, 256>}, {pipeline_mode = #tpu.pipeline_mode<synchronous>, transform_indices = @transform_5, window_bounds = array<i64: 256, 128>}, {pipeline_mode = #tpu.pipeline_mode<synchronous>, transform_indices = @transform_6, window_bounds = array<i64: 1, 128>}, {transform_indices = @transform_7, window_bounds = array<i64: 16, 128>}]} {
    %c0 = arith.constant 0 : index
    %c0_0 = arith.constant 0 : index
    %0 = vector.load %arg1[%c0, %c0_0] : memref<16x512xf32, #tpu.memory_space<vmem>>, vector<16x512xf32>
    %1 = arith.truncf %0 : vector<16x512xf32> to vector<16x512xbf16>
    %c0_1 = arith.constant 0 : index
    %c0_2 = arith.constant 0 : index
    %2 = vector.load %arg2[%c0_1, %c0_2] : memref<512x256xbf16, #tpu.memory_space<vmem>>, vector<512x256xbf16>
    %cst = arith.constant dense<0.000000e+00> : vector<16x256xf32>
    %3 = tpu.matmul %1, %2, %cst {dimension_numbers = #tpu.dot_dimension_numbers<[1], [0], [0], [1], [0, 0, 1, 1], [], []>} : vector<16x512xbf16>, vector<512x256xbf16>, vector<16x256xf32> -> vector<16x256xf32>
    %c0_3 = arith.constant 0 : index
    %c0_4 = arith.constant 0 : index
    %4 = vector.load %arg3[%c0_3, %c0_4] : memref<1x256xf32, #tpu.memory_space<vmem>>, vector<1x256xf32>
    %5 = vector.broadcast %4 : vector<1x256xf32> to vector<16x256xf32>
    %6 = arith.addf %3, %5 : vector<16x256xf32>
    %cst_5 = arith.constant 0.000000e+00 : f32
    %7 = vector.broadcast %cst_5 : f32 to vector<16x256xf32>
    %8 = arith.maximumf %6, %7 : vector<16x256xf32>
    %9 = arith.truncf %8 : vector<16x256xf32> to vector<16x256xbf16>
    %c0_6 = arith.constant 0 : index
    %c0_7 = arith.constant 0 : index
    %10 = vector.load %arg4[%c0_6, %c0_7] : memref<256x256xbf16, #tpu.memory_space<vmem>>, vector<256x256xbf16>
    %cst_8 = arith.constant dense<0.000000e+00> : vector<16x256xf32>
    %11 = tpu.matmul %9, %10, %cst_8 {dimension_numbers = #tpu.dot_dimension_numbers<[1], [0], [0], [1], [0, 0, 1, 1], [], []>} : vector<16x256xbf16>, vector<256x256xbf16>, vector<16x256xf32> -> vector<16x256xf32>
    %c0_9 = arith.constant 0 : index
    %c0_10 = arith.constant 0 : index
    %12 = vector.load %arg5[%c0_9, %c0_10] : memref<1x256xf32, #tpu.memory_space<vmem>>, vector<1x256xf32>
    %13 = vector.broadcast %12 : vector<1x256xf32> to vector<16x256xf32>
    %14 = arith.addf %11, %13 : vector<16x256xf32>
    %cst_11 = arith.constant 0.000000e+00 : f32
    %15 = vector.broadcast %cst_11 : f32 to vector<16x256xf32>
    %16 = arith.maximumf %14, %15 : vector<16x256xf32>
    %17 = arith.truncf %16 : vector<16x256xf32> to vector<16x256xbf16>
    %c0_12 = arith.constant 0 : index
    %c0_13 = arith.constant 0 : index
    %18 = vector.load %arg6[%c0_12, %c0_13] : memref<256x128xbf16, #tpu.memory_space<vmem>>, vector<256x128xbf16>
    %cst_14 = arith.constant dense<0.000000e+00> : vector<16x128xf32>
    %19 = tpu.matmul %17, %18, %cst_14 {dimension_numbers = #tpu.dot_dimension_numbers<[1], [0], [0], [1], [0, 0, 1, 1], [], []>} : vector<16x256xbf16>, vector<256x128xbf16>, vector<16x128xf32> -> vector<16x128xf32>
    %c0_15 = arith.constant 0 : index
    %c0_16 = arith.constant 0 : index
    %20 = vector.load %arg7[%c0_15, %c0_16] : memref<1x128xf32, #tpu.memory_space<vmem>>, vector<1x128xf32>
    %21 = vector.broadcast %20 : vector<1x128xf32> to vector<16x128xf32>
    %22 = arith.addf %19, %21 : vector<16x128xf32>
    %23 = arith.truncf %22 : vector<16x128xf32> to vector<16x128xbf16>
    %c0_17 = arith.constant 0 : index
    %c0_18 = arith.constant 0 : index
    %24 = vector.load %arg8[%c0_17, %c0_18] : memref<16x128xbf16, #tpu.memory_space<vmem>>, vector<16x128xbf16>
    tpu.vector_store %arg8[%c0_17, %c0_18], %23 {strides = array<i32>} : memref<16x128xbf16, #tpu.memory_space<vmem>>, vector<16x128xbf16>,
    return
  }
  func.func @transform_0(%arg0: i32) -> (i32, i32) {
    %c0_i32 = arith.constant 0 : i32
    %c0_i32_0 = arith.constant 0 : i32
    return %arg0, %c0_i32 : i32, i32
  }
  func.func @transform_1(%arg0: i32) -> (i32, i32) {
    %c0_i32 = arith.constant 0 : i32
    %c0_i32_0 = arith.constant 0 : i32
    %c0_i32_1 = arith.constant 0 : i32
    return %c0_i32, %c0_i32_0 : i32, i32
  }
  func.func @transform_2(%arg0: i32) -> (i32, i32) {
    %c0_i32 = arith.constant 0 : i32
    %c0_i32_0 = arith.constant 0 : i32
    %c0_i32_1 = arith.constant 0 : i32
    return %c0_i32, %c0_i32_0 : i32, i32
  }
  func.func @transform_3(%arg0: i32) -> (i32, i32) {
    %c0_i32 = arith.constant 0 : i32
    %c0_i32_0 = arith.constant 0 : i32
    %c0_i32_1 = arith.constant 0 : i32
    return %c0_i32, %c0_i32_0 : i32, i32
  }
  func.func @transform_4(%arg0: i32) -> (i32, i32) {
    %c0_i32 = arith.constant 0 : i32
    %c0_i32_0 = arith.constant 0 : i32
    %c0_i32_1 = arith.constant 0 : i32
    return %c0_i32, %c0_i32_0 : i32, i32
  }
  func.func @transform_5(%arg0: i32) -> (i32, i32) {
    %c0_i32 = arith.constant 0 : i32
    %c0_i32_0 = arith.constant 0 : i32
    %c0_i32_1 = arith.constant 0 : i32
    return %c0_i32, %c0_i32_0 : i32, i32
  }
  func.func @transform_6(%arg0: i32) -> (i32, i32) {
    %c0_i32 = arith.constant 0 : i32
    %c0_i32_0 = arith.constant 0 : i32
    %c0_i32_1 = arith.constant 0 : i32
    return %c0_i32, %c0_i32_0 : i32, i32
  }
  func.func @transform_7(%arg0: i32) -> (i32, i32) {
    %c0_i32 = arith.constant 0 : i32
    %c0_i32_0 = arith.constant 0 : i32
    return %arg0, %c0_i32 : i32, i32
  }
}

module attributes {stable_mosaic.version = 11 : i64} {
  func.func @_dual_gru_kernel(%arg0: i32, %arg1: memref<8x2x128xbf16, #tpu.memory_space<vmem>>, %arg2: memref<128x768xbf16, #tpu.memory_space<vmem>>, %arg3: memref<1x768xf32, #tpu.memory_space<vmem>>, %arg4: memref<128x384xbf16, #tpu.memory_space<vmem>>, %arg5: memref<1x384xf32, #tpu.memory_space<vmem>>, %arg6: memref<128x384xbf16, #tpu.memory_space<vmem>>, %arg7: memref<1x384xf32, #tpu.memory_space<vmem>>, %arg8: memref<8x2x256xf32, #tpu.memory_space<vmem>>, %arg9: memref<2x256xf32, #tpu.memory_space<vmem>>) attributes {dimension_semantics = [#tpu.dimension_semantics<arbitrary>], iteration_bounds = array<i64: 1>, scalar_prefetch = 0 : i64, scratch_operands = 1 : i64, tpu.core_type = #tpu.core_type<tc>, window_params = [{transform_indices = @transform_0, window_bounds = array<i64: 8, 2, 128>}, {pipeline_mode = #tpu.pipeline_mode<synchronous>, transform_indices = @transform_1, window_bounds = array<i64: 128, 768>}, {pipeline_mode = #tpu.pipeline_mode<synchronous>, transform_indices = @transform_2, window_bounds = array<i64: 1, 768>}, {pipeline_mode = #tpu.pipeline_mode<synchronous>, transform_indices = @transform_3, window_bounds = array<i64: 128, 384>}, {pipeline_mode = #tpu.pipeline_mode<synchronous>, transform_indices = @transform_4, window_bounds = array<i64: 1, 384>}, {pipeline_mode = #tpu.pipeline_mode<synchronous>, transform_indices = @transform_5, window_bounds = array<i64: 128, 384>}, {pipeline_mode = #tpu.pipeline_mode<synchronous>, transform_indices = @transform_6, window_bounds = array<i64: 1, 384>}, {transform_indices = @transform_7, window_bounds = array<i64: 8, 2, 256>}]} {
    %c0_i32 = arith.constant 0 : i32
    %0 = arith.cmpi eq, %arg0, %c0_i32 : i32
    %1 = arith.extui %0 : i1 to i32
    %c0_i32_0 = arith.constant 0 : i32
    %2 = arith.cmpi ne, %1, %c0_i32_0 : i32
    scf.if %2 {
      %cst = arith.constant 0.000000e+00 : f32
      %7 = vector.broadcast %cst : f32 to vector<2x256xf32>
      %c0_6 = arith.constant 0 : index
      %c0_7 = arith.constant 0 : index
      %8 = vector.load %arg9[%c0_6, %c0_7] : memref<2x256xf32, #tpu.memory_space<vmem>>, vector<2x256xf32>
      tpu.vector_store %arg9[%c0_6, %c0_7], %7 {strides = array<i32>} : memref<2x256xf32, #tpu.memory_space<vmem>>, vector<2x256xf32>,
    } else {
    }
    %c0 = arith.constant 0 : index
    %c0_1 = arith.constant 0 : index
    %3 = vector.load %arg9[%c0, %c0_1] : memref<2x256xf32, #tpu.memory_space<vmem>>, vector<2x256xf32>
    %c0_i32_2 = arith.constant 0 : i32
    %c8_i32 = arith.constant 8 : i32
    %4 = arith.addi %c0_i32_2, %c8_i32 : i32
    %c1_i32 = arith.constant 1 : i32
    %5 = scf.for %arg10 = %c0_i32_2 to %4 step %c1_i32 iter_args(%arg11 = %3) -> (vector<2x256xf32>)  : i32 {
      %7 = arith.index_cast %arg10 : i32 to index
      %c0_6 = arith.constant 0 : index
      %c0_7 = arith.constant 0 : index
      %8 = vector.load %arg1[%7, %c0_6, %c0_7] : memref<8x2x128xbf16, #tpu.memory_space<vmem>>, vector<1x2x128xbf16>
      %9 = vector.shape_cast %8 : vector<1x2x128xbf16> to vector<2x128xbf16>
      %c0_8 = arith.constant 0 : index
      %c0_9 = arith.constant 0 : index
      %10 = vector.load %arg2[%c0_8, %c0_9] : memref<128x768xbf16, #tpu.memory_space<vmem>>, vector<128x768xbf16>
      %cst = arith.constant dense<0.000000e+00> : vector<2x768xf32>
      %11 = tpu.matmul %9, %10, %cst {dimension_numbers = #tpu.dot_dimension_numbers<[1], [0], [0], [1], [0, 0, 1, 1], [], []>} : vector<2x128xbf16>, vector<128x768xbf16>, vector<2x768xf32> -> vector<2x768xf32>
      %c0_10 = arith.constant 0 : index
      %c0_11 = arith.constant 0 : index
      %12 = vector.load %arg3[%c0_10, %c0_11] : memref<1x768xf32, #tpu.memory_space<vmem>>, vector<1x768xf32>
      %13 = vector.broadcast %12 : vector<1x768xf32> to vector<2x768xf32>
      %14 = arith.addf %11, %13 : vector<2x768xf32>
      %15 = vector.extract_strided_slice %arg11 {offsets = [0, 0], sizes = [2, 128], strides = [1, 1]} : vector<2x256xf32> to vector<2x128xf32>
      %16 = vector.extract_strided_slice %arg11 {offsets = [0, 128], sizes = [2, 128], strides = [1, 1]} : vector<2x256xf32> to vector<2x128xf32>
      %17 = arith.truncf %15 : vector<2x128xf32> to vector<2x128xbf16>
      %c0_12 = arith.constant 0 : index
      %c0_13 = arith.constant 0 : index
      %18 = vector.load %arg4[%c0_12, %c0_13] : memref<128x384xbf16, #tpu.memory_space<vmem>>, vector<128x384xbf16>
      %cst_14 = arith.constant dense<0.000000e+00> : vector<2x384xf32>
      %19 = tpu.matmul %17, %18, %cst_14 {dimension_numbers = #tpu.dot_dimension_numbers<[1], [0], [0], [1], [0, 0, 1, 1], [], []>} : vector<2x128xbf16>, vector<128x384xbf16>, vector<2x384xf32> -> vector<2x384xf32>
      %c0_15 = arith.constant 0 : index
      %c0_16 = arith.constant 0 : index
      %20 = vector.load %arg5[%c0_15, %c0_16] : memref<1x384xf32, #tpu.memory_space<vmem>>, vector<1x384xf32>
      %21 = vector.broadcast %20 : vector<1x384xf32> to vector<2x384xf32>
      %22 = arith.addf %19, %21 : vector<2x384xf32>
      %23 = arith.truncf %16 : vector<2x128xf32> to vector<2x128xbf16>
      %c0_17 = arith.constant 0 : index
      %c0_18 = arith.constant 0 : index
      %24 = vector.load %arg6[%c0_17, %c0_18] : memref<128x384xbf16, #tpu.memory_space<vmem>>, vector<128x384xbf16>
      %cst_19 = arith.constant dense<0.000000e+00> : vector<2x384xf32>
      %25 = tpu.matmul %23, %24, %cst_19 {dimension_numbers = #tpu.dot_dimension_numbers<[1], [0], [0], [1], [0, 0, 1, 1], [], []>} : vector<2x128xbf16>, vector<128x384xbf16>, vector<2x384xf32> -> vector<2x384xf32>
      %c0_20 = arith.constant 0 : index
      %c0_21 = arith.constant 0 : index
      %26 = vector.load %arg7[%c0_20, %c0_21] : memref<1x384xf32, #tpu.memory_space<vmem>>, vector<1x384xf32>
      %27 = vector.broadcast %26 : vector<1x384xf32> to vector<2x384xf32>
      %28 = arith.addf %25, %27 : vector<2x384xf32>
      %29 = vector.extract_strided_slice %14 {offsets = [0, 0], sizes = [2, 384], strides = [1, 1]} : vector<2x768xf32> to vector<2x384xf32>
      %30 = vector.extract_strided_slice %29 {offsets = [0, 0], sizes = [2, 128], strides = [1, 1]} : vector<2x384xf32> to vector<2x128xf32>
      %31 = vector.extract_strided_slice %22 {offsets = [0, 0], sizes = [2, 128], strides = [1, 1]} : vector<2x384xf32> to vector<2x128xf32>
      %32 = arith.addf %30, %31 : vector<2x128xf32>
      %33 = arith.negf %32 : vector<2x128xf32>
      %34 = math.exp %33 : vector<2x128xf32>
      %cst_22 = arith.constant 1.000000e+00 : f32
      %35 = vector.broadcast %cst_22 : f32 to vector<2x128xf32>
      %36 = arith.addf %35, %34 : vector<2x128xf32>
      %37 = arith.divf %35, %36 : vector<2x128xf32>
      %38 = vector.extract_strided_slice %29 {offsets = [0, 128], sizes = [2, 128], strides = [1, 1]} : vector<2x384xf32> to vector<2x128xf32>
      %39 = vector.extract_strided_slice %22 {offsets = [0, 128], sizes = [2, 128], strides = [1, 1]} : vector<2x384xf32> to vector<2x128xf32>
      %40 = arith.addf %38, %39 : vector<2x128xf32>
      %41 = arith.negf %40 : vector<2x128xf32>
      %42 = math.exp %41 : vector<2x128xf32>
      %cst_23 = arith.constant 1.000000e+00 : f32
      %43 = vector.broadcast %cst_23 : f32 to vector<2x128xf32>
      %44 = arith.addf %43, %42 : vector<2x128xf32>
      %45 = arith.divf %43, %44 : vector<2x128xf32>
      %46 = vector.extract_strided_slice %29 {offsets = [0, 256], sizes = [2, 128], strides = [1, 1]} : vector<2x384xf32> to vector<2x128xf32>
      %47 = vector.extract_strided_slice %22 {offsets = [0, 256], sizes = [2, 128], strides = [1, 1]} : vector<2x384xf32> to vector<2x128xf32>
      %48 = arith.mulf %37, %47 : vector<2x128xf32>
      %49 = arith.addf %46, %48 : vector<2x128xf32>
      %50 = math.tanh %49 : vector<2x128xf32>
      %cst_24 = arith.constant 1.000000e+00 : f32
      %51 = vector.broadcast %cst_24 : f32 to vector<2x128xf32>
      %52 = arith.subf %51, %45 : vector<2x128xf32>
      %53 = arith.mulf %52, %50 : vector<2x128xf32>
      %54 = arith.mulf %45, %15 : vector<2x128xf32>
      %55 = arith.addf %53, %54 : vector<2x128xf32>
      %56 = vector.extract_strided_slice %14 {offsets = [0, 384], sizes = [2, 384], strides = [1, 1]} : vector<2x768xf32> to vector<2x384xf32>
      %57 = vector.extract_strided_slice %56 {offsets = [0, 0], sizes = [2, 128], strides = [1, 1]} : vector<2x384xf32> to vector<2x128xf32>
      %58 = vector.extract_strided_slice %28 {offsets = [0, 0], sizes = [2, 128], strides = [1, 1]} : vector<2x384xf32> to vector<2x128xf32>
      %59 = arith.addf %57, %58 : vector<2x128xf32>
      %60 = arith.negf %59 : vector<2x128xf32>
      %61 = math.exp %60 : vector<2x128xf32>
      %cst_25 = arith.constant 1.000000e+00 : f32
      %62 = vector.broadcast %cst_25 : f32 to vector<2x128xf32>
      %63 = arith.addf %62, %61 : vector<2x128xf32>
      %64 = arith.divf %62, %63 : vector<2x128xf32>
      %65 = vector.extract_strided_slice %56 {offsets = [0, 128], sizes = [2, 128], strides = [1, 1]} : vector<2x384xf32> to vector<2x128xf32>
      %66 = vector.extract_strided_slice %28 {offsets = [0, 128], sizes = [2, 128], strides = [1, 1]} : vector<2x384xf32> to vector<2x128xf32>
      %67 = arith.addf %65, %66 : vector<2x128xf32>
      %68 = arith.negf %67 : vector<2x128xf32>
      %69 = math.exp %68 : vector<2x128xf32>
      %cst_26 = arith.constant 1.000000e+00 : f32
      %70 = vector.broadcast %cst_26 : f32 to vector<2x128xf32>
      %71 = arith.addf %70, %69 : vector<2x128xf32>
      %72 = arith.divf %70, %71 : vector<2x128xf32>
      %73 = vector.extract_strided_slice %56 {offsets = [0, 256], sizes = [2, 128], strides = [1, 1]} : vector<2x384xf32> to vector<2x128xf32>
      %74 = vector.extract_strided_slice %28 {offsets = [0, 256], sizes = [2, 128], strides = [1, 1]} : vector<2x384xf32> to vector<2x128xf32>
      %75 = arith.mulf %64, %74 : vector<2x128xf32>
      %76 = arith.addf %73, %75 : vector<2x128xf32>
      %77 = math.tanh %76 : vector<2x128xf32>
      %cst_27 = arith.constant 1.000000e+00 : f32
      %78 = vector.broadcast %cst_27 : f32 to vector<2x128xf32>
      %79 = arith.subf %78, %72 : vector<2x128xf32>
      %80 = arith.mulf %79, %77 : vector<2x128xf32>
      %81 = arith.mulf %72, %16 : vector<2x128xf32>
      %82 = arith.addf %80, %81 : vector<2x128xf32>
      %83 = tpu.concatenate %55, %82 in 1 : vector<2x128xf32>, vector<2x128xf32> -> vector<2x256xf32>
      %84 = vector.shape_cast %83 : vector<2x256xf32> to vector<1x2x256xf32>
      %85 = arith.index_cast %arg10 : i32 to index
      %c0_28 = arith.constant 0 : index
      %c0_29 = arith.constant 0 : index
      %86 = vector.load %arg8[%85, %c0_28, %c0_29] : memref<8x2x256xf32, #tpu.memory_space<vmem>>, vector<1x2x256xf32>
      tpu.vector_store %arg8[%85, %c0_28, %c0_29], %84 {strides = array<i32>} : memref<8x2x256xf32, #tpu.memory_space<vmem>>, vector<1x2x256xf32>,
      scf.yield %83 : vector<2x256xf32>
    }
    %c8_i32_3 = arith.constant 8 : i32
    %c0_4 = arith.constant 0 : index
    %c0_5 = arith.constant 0 : index
    %6 = vector.load %arg9[%c0_4, %c0_5] : memref<2x256xf32, #tpu.memory_space<vmem>>, vector<2x256xf32>
    tpu.vector_store %arg9[%c0_4, %c0_5], %5 {strides = array<i32>} : memref<2x256xf32, #tpu.memory_space<vmem>>, vector<2x256xf32>,
    return
  }
  func.func @transform_0(%arg0: i32) -> (i32, i32, i32) {
    %c0_i32 = arith.constant 0 : i32
    %c0_i32_0 = arith.constant 0 : i32
    %c0_i32_1 = arith.constant 0 : i32
    return %arg0, %c0_i32, %c0_i32_0 : i32, i32, i32
  }
  func.func @transform_1(%arg0: i32) -> (i32, i32) {
    %c0_i32 = arith.constant 0 : i32
    %c0_i32_0 = arith.constant 0 : i32
    %c0_i32_1 = arith.constant 0 : i32
    return %c0_i32, %c0_i32_0 : i32, i32
  }
  func.func @transform_2(%arg0: i32) -> (i32, i32) {
    %c0_i32 = arith.constant 0 : i32
    %c0_i32_0 = arith.constant 0 : i32
    %c0_i32_1 = arith.constant 0 : i32
    return %c0_i32, %c0_i32_0 : i32, i32
  }
  func.func @transform_3(%arg0: i32) -> (i32, i32) {
    %c0_i32 = arith.constant 0 : i32
    %c0_i32_0 = arith.constant 0 : i32
    %c0_i32_1 = arith.constant 0 : i32
    return %c0_i32, %c0_i32_0 : i32, i32
  }
  func.func @transform_4(%arg0: i32) -> (i32, i32) {
    %c0_i32 = arith.constant 0 : i32
    %c0_i32_0 = arith.constant 0 : i32
    %c0_i32_1 = arith.constant 0 : i32
    return %c0_i32, %c0_i32_0 : i32, i32
  }
  func.func @transform_5(%arg0: i32) -> (i32, i32) {
    %c0_i32 = arith.constant 0 : i32
    %c0_i32_0 = arith.constant 0 : i32
    %c0_i32_1 = arith.constant 0 : i32
    return %c0_i32, %c0_i32_0 : i32, i32
  }
  func.func @transform_6(%arg0: i32) -> (i32, i32) {
    %c0_i32 = arith.constant 0 : i32
    %c0_i32_0 = arith.constant 0 : i32
    %c0_i32_1 = arith.constant 0 : i32
    return %c0_i32, %c0_i32_0 : i32, i32
  }
  func.func @transform_7(%arg0: i32) -> (i32, i32, i32) {
    %c0_i32 = arith.constant 0 : i32
    %c0_i32_0 = arith.constant 0 : i32
    %c0_i32_1 = arith.constant 0 : i32
    return %arg0, %c0_i32, %c0_i32_0 : i32, i32, i32
  }
}

module attributes {stable_mosaic.version = 11 : i64} {
  func.func @_heads_kernel(%arg0: i32, %arg1: i32, %arg2: memref<1x8x256xf32, #tpu.memory_space<vmem>>, %arg3: memref<128x16xbf16, #tpu.memory_space<vmem>>, %arg4: memref<1x16xf32, #tpu.memory_space<vmem>>, %arg5: memref<128x21xbf16, #tpu.memory_space<vmem>>, %arg6: memref<1x21xf32, #tpu.memory_space<vmem>>, %arg7: memref<256x336xbf16, #tpu.memory_space<vmem>>, %arg8: memref<1x336xf32, #tpu.memory_space<vmem>>, %arg9: memref<336x16xf32, #tpu.memory_space<vmem>>, %arg10: memref<16x336xf32, #tpu.memory_space<vmem>>, %arg11: memref<1x8x16xf32, #tpu.memory_space<vmem>>, %arg12: memref<1x8x21xf32, #tpu.memory_space<vmem>>, %arg13: memref<1x8x336xf32, #tpu.memory_space<vmem>>, %arg14: memref<1x8x336xf32, #tpu.memory_space<vmem>>) attributes {dimension_semantics = [#tpu.dimension_semantics<parallel>, #tpu.dimension_semantics<parallel>], iteration_bounds = array<i64: 2, 1>, scalar_prefetch = 0 : i64, scratch_operands = 0 : i64, tpu.core_type = #tpu.core_type<tc>, window_params = [{transform_indices = @transform_0, window_bounds = array<i64: 1, 8, 256>}, {pipeline_mode = #tpu.pipeline_mode<synchronous>, transform_indices = @transform_1, window_bounds = array<i64: 128, 16>}, {pipeline_mode = #tpu.pipeline_mode<synchronous>, transform_indices = @transform_2, window_bounds = array<i64: 1, 16>}, {pipeline_mode = #tpu.pipeline_mode<synchronous>, transform_indices = @transform_3, window_bounds = array<i64: 128, 21>}, {pipeline_mode = #tpu.pipeline_mode<synchronous>, transform_indices = @transform_4, window_bounds = array<i64: 1, 21>}, {pipeline_mode = #tpu.pipeline_mode<synchronous>, transform_indices = @transform_5, window_bounds = array<i64: 256, 336>}, {pipeline_mode = #tpu.pipeline_mode<synchronous>, transform_indices = @transform_6, window_bounds = array<i64: 1, 336>}, {pipeline_mode = #tpu.pipeline_mode<synchronous>, transform_indices = @transform_7, window_bounds = array<i64: 336, 16>}, {pipeline_mode = #tpu.pipeline_mode<synchronous>, transform_indices = @transform_8, window_bounds = array<i64: 16, 336>}, {transform_indices = @transform_9, window_bounds = array<i64: 1, 8, 16>}, {transform_indices = @transform_10, window_bounds = array<i64: 1, 8, 21>}, {transform_indices = @transform_11, window_bounds = array<i64: 1, 8, 336>}, {transform_indices = @transform_12, window_bounds = array<i64: 1, 8, 336>}]} {
    %c0 = arith.constant 0 : index
    %c0_0 = arith.constant 0 : index
    %c0_1 = arith.constant 0 : index
    %0 = vector.load %arg2[%c0, %c0_0, %c0_1] : memref<1x8x256xf32, #tpu.memory_space<vmem>>, vector<1x8x256xf32>
    %1 = vector.shape_cast %0 : vector<1x8x256xf32> to vector<8x256xf32>
    %2 = arith.truncf %1 : vector<8x256xf32> to vector<8x256xbf16>
    %3 = vector.extract_strided_slice %2 {offsets = [0, 0], sizes = [8, 128], strides = [1, 1]} : vector<8x256xbf16> to vector<8x128xbf16>
    %4 = vector.extract_strided_slice %2 {offsets = [0, 128], sizes = [8, 128], strides = [1, 1]} : vector<8x256xbf16> to vector<8x128xbf16>
    %c0_2 = arith.constant 0 : index
    %c0_3 = arith.constant 0 : index
    %5 = vector.load %arg3[%c0_2, %c0_3] : memref<128x16xbf16, #tpu.memory_space<vmem>>, vector<128x16xbf16>
    %cst = arith.constant dense<0.000000e+00> : vector<8x16xf32>
    %6 = tpu.matmul %3, %5, %cst {dimension_numbers = #tpu.dot_dimension_numbers<[1], [0], [0], [1], [0, 0, 1, 1], [], []>} : vector<8x128xbf16>, vector<128x16xbf16>, vector<8x16xf32> -> vector<8x16xf32>
    %c0_4 = arith.constant 0 : index
    %c0_5 = arith.constant 0 : index
    %7 = vector.load %arg4[%c0_4, %c0_5] : memref<1x16xf32, #tpu.memory_space<vmem>>, vector<1x16xf32>
    %8 = vector.broadcast %7 : vector<1x16xf32> to vector<8x16xf32>
    %9 = arith.addf %6, %8 : vector<8x16xf32>
    %10 = arith.negf %9 : vector<8x16xf32>
    %11 = math.exp %10 : vector<8x16xf32>
    %cst_6 = arith.constant 1.000000e+00 : f32
    %12 = vector.broadcast %cst_6 : f32 to vector<8x16xf32>
    %13 = arith.addf %12, %11 : vector<8x16xf32>
    %14 = arith.divf %12, %13 : vector<8x16xf32>
    %c0_7 = arith.constant 0 : index
    %c0_8 = arith.constant 0 : index
    %15 = vector.load %arg5[%c0_7, %c0_8] : memref<128x21xbf16, #tpu.memory_space<vmem>>, vector<128x21xbf16>
    %cst_9 = arith.constant dense<0.000000e+00> : vector<8x21xf32>
    %16 = tpu.matmul %4, %15, %cst_9 {dimension_numbers = #tpu.dot_dimension_numbers<[1], [0], [0], [1], [0, 0, 1, 1], [], []>} : vector<8x128xbf16>, vector<128x21xbf16>, vector<8x21xf32> -> vector<8x21xf32>
    %c0_10 = arith.constant 0 : index
    %c0_11 = arith.constant 0 : index
    %17 = vector.load %arg6[%c0_10, %c0_11] : memref<1x21xf32, #tpu.memory_space<vmem>>, vector<1x21xf32>
    %18 = vector.broadcast %17 : vector<1x21xf32> to vector<8x21xf32>
    %19 = arith.addf %16, %18 : vector<8x21xf32>
    %c0_12 = arith.constant 0 : index
    %c0_13 = arith.constant 0 : index
    %20 = vector.load %arg7[%c0_12, %c0_13] : memref<256x336xbf16, #tpu.memory_space<vmem>>, vector<256x336xbf16>
    %cst_14 = arith.constant dense<0.000000e+00> : vector<8x336xf32>
    %21 = tpu.matmul %2, %20, %cst_14 {dimension_numbers = #tpu.dot_dimension_numbers<[1], [0], [0], [1], [0, 0, 1, 1], [], []>} : vector<8x256xbf16>, vector<256x336xbf16>, vector<8x336xf32> -> vector<8x336xf32>
    %c0_15 = arith.constant 0 : index
    %c0_16 = arith.constant 0 : index
    %22 = vector.load %arg8[%c0_15, %c0_16] : memref<1x336xf32, #tpu.memory_space<vmem>>, vector<1x336xf32>
    %23 = vector.broadcast %22 : vector<1x336xf32> to vector<8x336xf32>
    %24 = arith.addf %21, %23 : vector<8x336xf32>
    %cst_17 = arith.constant dense<0xFF800000> : vector<8xf32>
    %25 = vector.multi_reduction <maximumf>, %24, %cst_17 [1] : vector<8x336xf32> to vector<8xf32>
    %26 = vector.shape_cast %25 : vector<8xf32> to vector<8x1xf32>
    %27 = vector.broadcast %26 : vector<8x1xf32> to vector<8x336xf32>
    %28 = arith.subf %24, %27 : vector<8x336xf32>
    %29 = math.exp %28 : vector<8x336xf32>
    %c0_18 = arith.constant 0 : index
    %c0_19 = arith.constant 0 : index
    %30 = vector.load %arg9[%c0_18, %c0_19] : memref<336x16xf32, #tpu.memory_space<vmem>>, vector<336x16xf32>
    %cst_20 = arith.constant dense<0.000000e+00> : vector<8x16xf32>
    %31 = tpu.matmul %29, %30, %cst_20 {dimension_numbers = #tpu.dot_dimension_numbers<[1], [0], [0], [1], [0, 0, 1, 1], [], []>} : vector<8x336xf32>, vector<336x16xf32>, vector<8x16xf32> -> vector<8x16xf32>
    %c0_21 = arith.constant 0 : index
    %c0_22 = arith.constant 0 : index
    %32 = vector.load %arg10[%c0_21, %c0_22] : memref<16x336xf32, #tpu.memory_space<vmem>>, vector<16x336xf32>
    %cst_23 = arith.constant dense<0.000000e+00> : vector<8x336xf32>
    %33 = tpu.matmul %31, %32, %cst_23 {dimension_numbers = #tpu.dot_dimension_numbers<[1], [0], [0], [1], [0, 0, 1, 1], [], []>} : vector<8x16xf32>, vector<16x336xf32>, vector<8x336xf32> -> vector<8x336xf32>
    %34 = arith.divf %29, %33 : vector<8x336xf32>
    %c0_24 = arith.constant 0 : index
    %c0_25 = arith.constant 0 : index
    %c0_26 = arith.constant 0 : index
    %35 = vector.load %arg11[%c0_24, %c0_25, %c0_26] : memref<1x8x16xf32, #tpu.memory_space<vmem>>, vector<1x8x16xf32>
    %36 = vector.shape_cast %35 : vector<1x8x16xf32> to vector<8x16xf32>
    %37 = vector.shape_cast %14 : vector<8x16xf32> to vector<1x8x16xf32>
    tpu.vector_store %arg11[%c0_24, %c0_25, %c0_26], %37 {strides = array<i32>} : memref<1x8x16xf32, #tpu.memory_space<vmem>>, vector<1x8x16xf32>,
    %c0_27 = arith.constant 0 : index
    %c0_28 = arith.constant 0 : index
    %c0_29 = arith.constant 0 : index
    %38 = vector.load %arg12[%c0_27, %c0_28, %c0_29] : memref<1x8x21xf32, #tpu.memory_space<vmem>>, vector<1x8x21xf32>
    %39 = vector.shape_cast %38 : vector<1x8x21xf32> to vector<8x21xf32>
    %40 = vector.shape_cast %19 : vector<8x21xf32> to vector<1x8x21xf32>
    tpu.vector_store %arg12[%c0_27, %c0_28, %c0_29], %40 {strides = array<i32>} : memref<1x8x21xf32, #tpu.memory_space<vmem>>, vector<1x8x21xf32>,
    %c0_30 = arith.constant 0 : index
    %c0_31 = arith.constant 0 : index
    %c0_32 = arith.constant 0 : index
    %41 = vector.load %arg13[%c0_30, %c0_31, %c0_32] : memref<1x8x336xf32, #tpu.memory_space<vmem>>, vector<1x8x336xf32>
    %42 = vector.shape_cast %41 : vector<1x8x336xf32> to vector<8x336xf32>
    %43 = vector.shape_cast %24 : vector<8x336xf32> to vector<1x8x336xf32>
    tpu.vector_store %arg13[%c0_30, %c0_31, %c0_32], %43 {strides = array<i32>} : memref<1x8x336xf32, #tpu.memory_space<vmem>>, vector<1x8x336xf32>,
    %c0_33 = arith.constant 0 : index
    %c0_34 = arith.constant 0 : index
    %c0_35 = arith.constant 0 : index
    %44 = vector.load %arg14[%c0_33, %c0_34, %c0_35] : memref<1x8x336xf32, #tpu.memory_space<vmem>>, vector<1x8x336xf32>
    %45 = vector.shape_cast %44 : vector<1x8x336xf32> to vector<8x336xf32>
    %46 = vector.shape_cast %34 : vector<8x336xf32> to vector<1x8x336xf32>
    tpu.vector_store %arg14[%c0_33, %c0_34, %c0_35], %46 {strides = array<i32>} : memref<1x8x336xf32, #tpu.memory_space<vmem>>, vector<1x8x336xf32>,
    return
  }
  func.func @transform_0(%arg0: i32, %arg1: i32) -> (i32, i32, i32) {
    %c0_i32 = arith.constant 0 : i32
    %c0_i32_0 = arith.constant 0 : i32
    return %arg0, %arg1, %c0_i32 : i32, i32, i32
  }
  func.func @transform_1(%arg0: i32, %arg1: i32) -> (i32, i32) {
    %c0_i32 = arith.constant 0 : i32
    %c0_i32_0 = arith.constant 0 : i32
    %c0_i32_1 = arith.constant 0 : i32
    return %c0_i32, %c0_i32_0 : i32, i32
  }
  func.func @transform_2(%arg0: i32, %arg1: i32) -> (i32, i32) {
    %c0_i32 = arith.constant 0 : i32
    %c0_i32_0 = arith.constant 0 : i32
    %c0_i32_1 = arith.constant 0 : i32
    return %c0_i32, %c0_i32_0 : i32, i32
  }
  func.func @transform_3(%arg0: i32, %arg1: i32) -> (i32, i32) {
    %c0_i32 = arith.constant 0 : i32
    %c0_i32_0 = arith.constant 0 : i32
    %c0_i32_1 = arith.constant 0 : i32
    return %c0_i32, %c0_i32_0 : i32, i32
  }
  func.func @transform_4(%arg0: i32, %arg1: i32) -> (i32, i32) {
    %c0_i32 = arith.constant 0 : i32
    %c0_i32_0 = arith.constant 0 : i32
    %c0_i32_1 = arith.constant 0 : i32
    return %c0_i32, %c0_i32_0 : i32, i32
  }
  func.func @transform_5(%arg0: i32, %arg1: i32) -> (i32, i32) {
    %c0_i32 = arith.constant 0 : i32
    %c0_i32_0 = arith.constant 0 : i32
    %c0_i32_1 = arith.constant 0 : i32
    return %c0_i32, %c0_i32_0 : i32, i32
  }
  func.func @transform_6(%arg0: i32, %arg1: i32) -> (i32, i32) {
    %c0_i32 = arith.constant 0 : i32
    %c0_i32_0 = arith.constant 0 : i32
    %c0_i32_1 = arith.constant 0 : i32
    return %c0_i32, %c0_i32_0 : i32, i32
  }
  func.func @transform_7(%arg0: i32, %arg1: i32) -> (i32, i32) {
    %c0_i32 = arith.constant 0 : i32
    %c0_i32_0 = arith.constant 0 : i32
    %c0_i32_1 = arith.constant 0 : i32
    return %c0_i32, %c0_i32_0 : i32, i32
  }
  func.func @transform_8(%arg0: i32, %arg1: i32) -> (i32, i32) {
    %c0_i32 = arith.constant 0 : i32
    %c0_i32_0 = arith.constant 0 : i32
    %c0_i32_1 = arith.constant 0 : i32
    return %c0_i32, %c0_i32_0 : i32, i32
  }
  func.func @transform_9(%arg0: i32, %arg1: i32) -> (i32, i32, i32) {
    %c0_i32 = arith.constant 0 : i32
    %c0_i32_0 = arith.constant 0 : i32
    return %arg0, %arg1, %c0_i32 : i32, i32, i32
  }
  func.func @transform_10(%arg0: i32, %arg1: i32) -> (i32, i32, i32) {
    %c0_i32 = arith.constant 0 : i32
    %c0_i32_0 = arith.constant 0 : i32
    return %arg0, %arg1, %c0_i32 : i32, i32, i32
  }
  func.func @transform_11(%arg0: i32, %arg1: i32) -> (i32, i32, i32) {
    %c0_i32 = arith.constant 0 : i32
    %c0_i32_0 = arith.constant 0 : i32
    return %arg0, %arg1, %c0_i32 : i32, i32, i32
  }
  func.func @transform_12(%arg0: i32, %arg1: i32) -> (i32, i32, i32) {
    %c0_i32 = arith.constant 0 : i32
    %c0_i32_0 = arith.constant 0 : i32
    return %arg0, %arg1, %c0_i32 : i32, i32, i32
  }
}

</mosaic_0001>

<bundles_post_ra>
// kernel: eq.8
= control target key start
LH: loop header
LB: loop body
LE: loop exit
PB: predicated region body
PF: predicated region fallthrough
CT: control target
= control target key end

     0   :  { %vm9_vm0 = vcmask 15360   ;;  %vm22_vm1 = vcmask 31744   ;;  %s156_s14 = smov 126   ;;  %s157_s15 = smov 105   ;;  %vm3_vm2 = vcmask 171008   ;;  %vm13_vm3 = vcmask 154624   ;;  %s238_s0 = inlined_call_operand.vmem [shape: s32[16,21], index: 0, kind: input, shape index: {}]   ;;  %s239_s1 = inlined_call_operand.vmem [shape: s32[336], index: 1, kind: output, shape index: {}]  }
   0x1   :  { %v124_v0 = vld [vmem:[%s238_s0 + $0x6] sm:$0x1]   ;;  %v128_v3 = vld [vmem:[%s238_s0 + $0x5] sm:$0x1]   ;;  %v126_v4 = vld [vmem:[%s238_s0 + $0xc] sm:$0x1]  }
   0x2   :  { %v125_v1 = vld [vmem:[%s238_s0 + $0x6] sm:$0x1]   ;;  %34 = vrot.lane.b32.xlu1 %v128_v3, %s157_s15  ;;  %v127_v5 = vld [vmem:[%s238_s0 + $0xc] sm:$0x1]   ;;  %v129_v7 = vld [vmem:[%s238_s0 + $0xb] sm:$0x1]  }
   0x3   :  { %v10_v2 = vsel %vm9_vm0, %v125_v1, %v124_v0  ;;  %v23_v6 = vsel %vm22_vm1, %v127_v5, %v126_v4  ;;  %s158_s20 = smov 124   ;;  %s159_s21 = smov 103   ;;  %v130_v8 = vld [vmem:[%s238_s0 + $0x4] sm:$0x1]   ;;  %v131_v9 = vld [vmem:[%s238_s0 + $0xa] sm:$0x1]  }
   0x4   :  { %11 = vrot.lane.b32.xlu0 %v10_v2, %s156_s14  ;;  %v2_v10 = vld [vmem:[%s238_s0] sm:$0x1]   ;;  %s160_s28 = smov 84   ;;  %s161_s29 = smov 82   ;;  %v132_v11 = vld [vmem:[%s238_s0 + $0x3] sm:$0x1]  }
   0x5   :  { %4 = vst.msk [vmem:[#allocation0] sm:$0x1] %vm3_vm2, %v2_v10   ;;  %v133_v12 = vld [vmem:[%s238_s0 + $0x9] sm:$0x1]   ;;  %s162_s5 = smov 63   ;;  %s163_s6 = smov 61  }
   0x6   :  { %40 = vrot.lane.b32.xlu1 %v129_v7, %s159_s21  ;;  %v134_v13 = vld [vmem:[%s238_s0 + $0xf] sm:$0x1]   ;;  %v135_v14 = vld [vmem:[%s238_s0 + $0x2] sm:$0x1]   ;;  %s164_s11 = smov 59   ;;  %s165_s12 = smov 42  }
   0x7   :  { %v136_v15 = vld [vmem:[%s238_s0 + $0x8] sm:$0x1]   ;;  %v137_v16 = vld [vmem:[%s238_s0 + $0xe] sm:$0x1]   ;;  %s166_s17 = smov 40   ;;  %s167_s18 = smov 38  }
   0x8   :  { %24 = vrot.lane.b32.xlu0 %v23_v6, %s158_s20  ;;  %v138_v17 = vld [vmem:[%s238_s0 + $0x1] sm:$0x1]   ;;  %v139_v18 = vld [vmem:[%s238_s0 + $0x7] sm:$0x1]   ;;  %s168_s23 = smov 21   ;;  %s169_s24 = smov 19  }
   0x9   :  { %v140_v19 = vld [vmem:[%s238_s0 + $0xd] sm:$0x1]   ;;  %s170_s0 = smov 17   ;;  %vm16_vm4 = vcmask 1048560   ;;  %vm36_vm5 = vcmask 1032008   ;;  %vm26_vm6 = vcmask 138240  }
   0xa   :  { %53 = vrot.lane.b32.xlu1 %v131_v9, %s161_s29  ;;  %vm29_vm7 = vcmask 1048544   ;;  %vm42_vm8 = vcmask 1015608   ;;  %vm49_vm9 = vcmask 859808   ;;  %vm55_vm10 = vcmask 843408  }
   0xb   :  { %vm62_vm11 = vcmask 687608   ;;  %vm68_vm12 = vcmask 671208   ;;  %vm75_vm13 = vcmask 654808   ;;  %vm82_vm14 = vcmask 515408  }
   0xc   :  { %47 = vrot.lane.b32.xlu0 %v130_v8, %s160_s28  ;;  %vm88_vm15 = vcmask 499008   ;;  %vm95_vm0 = vcmask 482608   ;;  %vm102_vm1 = vcmask 343208   ;;  %vm108_vm2 = vcmask 326808  }
   0xe   :  { %66 = vrot.lane.b32.xlu1 %v133_v12, %s163_s6 }
  0x10   :  { %60 = vrot.lane.b32.xlu0 %v132_v11, %s162_s5 }
  0x12   :  { %80 = vrot.lane.b32.xlu1 %v135_v14, %s165_s12 }
  0x14   :  { %73 = vrot.lane.b32.xlu0 %v134_v13, %s164_s11 }
  0x16   :  { %93 = vrot.lane.b32.xlu1 %v137_v16, %s167_s18 }
  0x18   :  { %86 = vrot.lane.b32.xlu0 %v136_v15, %s166_s17 }
  0x1a   :  { %106 = vrot.lane.b32.xlu1 %v139_v18, %s169_s24 }
  0x1c   :  { %100 = vrot.lane.b32.xlu0 %v138_v17, %s168_s23 }
  0x20   :  { %113 = vrot.lane.b32.xlu0 %v140_v19, %s170_s0 }
  0x74   :  { %v35_v21 = vpop.permute.xlu1 %34  }
  0x76   :  { %v12_v20 = vpop.permute.xlu0 %11  }
  0x77   :  { %15 = vst.msk [vmem:[#allocation0 + $0x1] sm:$0x1] %vm13_vm3, %v12_v20   ;;  %vm115_vm3 = vcmask 310408  }
  0x78   :  { %17 = vst.msk [vmem:[#allocation0] sm:$0x1] %vm16_vm4, %v12_v20   ;;  %v41_v23 = vpop.permute.xlu1 %40  }
  0x79   :  { %37 = vst.msk [vmem:[#allocation0] sm:$0x1] %vm36_vm5, %v35_v21  }
  0x7a   :  { %v25_v22 = vpop.permute.xlu0 %24  }
  0x7b   :  { %28 = vst.msk [vmem:[#allocation0 + $0x2] sm:$0x1] %vm26_vm6, %v25_v22  }
  0x7c   :  { %31 = vst.msk [vmem:[#allocation0 + $0x1] sm:$0x1] %vm29_vm7, %v25_v22   ;;  %v54_v25 = vpop.permute.xlu1 %53  }
  0x7d   :  { %44 = vst.msk [vmem:[#allocation0 + $0x1] sm:$0x1] %vm42_vm8, %v41_v23  }
  0x7e   :  { %v48_v24 = vpop.permute.xlu0 %47   ;;  %57 = vst.msk [vmem:[#allocation0 + $0x1] sm:$0x1] %vm55_vm10, %v54_v25  }
  0x7f   :  { %50 = vst.msk [vmem:[#allocation0] sm:$0x1] %vm49_vm9, %v48_v24  }
  0x80   :  { %v67_v27 = vpop.permute.xlu1 %66  }
  0x81   :  { %70 = vst.msk [vmem:[#allocation0 + $0x1] sm:$0x1] %vm68_vm12, %v67_v27  }
  0x82   :  { %v61_v26 = vpop.permute.xlu0 %60  }
  0x83   :  { %63 = vst.msk [vmem:[#allocation0] sm:$0x1] %vm62_vm11, %v61_v26  }
  0x84   :  { %v81_v29 = vpop.permute.xlu1 %80  }
  0x85   :  { %83 = vst.msk [vmem:[#allocation0] sm:$0x1] %vm82_vm14, %v81_v29  }
  0x86   :  { %v74_v28 = vpop.permute.xlu0 %73  }
  0x87   :  { %77 = vst.msk [vmem:[#allocation0 + $0x2] sm:$0x1] %vm75_vm13, %v74_v28  }
  0x88   :  { %v94_v31 = vpop.permute.xlu1 %93  }
  0x89   :  { %97 = vst.msk [vmem:[#allocation0 + $0x2] sm:$0x1] %vm95_vm0, %v94_v31  }
  0x8a   :  { %v87_v30 = vpop.permute.xlu0 %86  }
  0x8b   :  { %90 = vst.msk [vmem:[#allocation0 + $0x1] sm:$0x1] %vm88_vm15, %v87_v30  }
  0x8c   :  { %v107_v33 = vpop.permute.xlu1 %106  }
  0x8d   :  { %110 = vst.msk [vmem:[#allocation0 + $0x1] sm:$0x1] %vm108_vm2, %v107_v33  }
  0x8e   :  { %v101_v32 = vpop.permute.xlu0 %100  }
  0x8f   :  { %103 = vst.msk [vmem:[#allocation0] sm:$0x1] %vm102_vm1, %v101_v32  }
  0x92   :  { %v114_v34 = vpop.permute.xlu0 %113  }
  0x93   :  { %117 = vst.msk [vmem:[#allocation0 + $0x2] sm:$0x1] %vm115_vm3, %v114_v34  }
  0x9a   :  { %v121_v35 = vld [vmem:[#allocation0] sm:$0xf] }
  0x9b   :  { %123 = vst [vmem:[%s239_s1] sm:$0xf] %v121_v35 }

// kernel: sst_ad_prerel_forward.3
= control target key start
LH: loop header
LB: loop body
LE: loop exit
PB: predicated region body
PF: predicated region fallthrough
CT: control target
= control target key end

     0   :  { %s1694_s1 = inlined_call_operand.vmem [shape: bf16[512,256], index: 1, kind: input, shape index: {}]   ;;  %s1695_s0 = inlined_call_operand.vmem [shape: f32[16,512], index: 0, kind: input, shape index: {}]   ;;  %s1696_s3 = inlined_call_operand.vmem [shape: bf16[256,256], index: 3, kind: input, shape index: {}]   ;;  %s1697_s5 = inlined_call_operand.vmem [shape: bf16[256,128], index: 5, kind: input, shape index: {}]   ;;  %s1698_s2 = inlined_call_operand.vmem [shape: f32[1,256], index: 2, kind: input, shape index: {}]   ;;  %s1699_s4 = inlined_call_operand.vmem [shape: f32[1,256], index: 4, kind: input, shape index: {}]   ;;  %s1700_s6 = inlined_call_operand.vmem [shape: f32[1,128], index: 6, kind: input, shape index: {}]   ;;  %s1701_s7 = inlined_call_operand.vmem [shape: bf16[16,128], index: 7, kind: output, shape index: {}]  }
   0x1   :  { %v1122_v0 = vld [vmem:[%s1694_s1 + $0x4] ss:$8 sps:$4 sm:$0xff]   ;;  %v1124_v1 = vld [vmem:[%s1694_s1] ss:$8 sps:$4 sm:$0xff]   ;;  %v1125_v2 = vld [vmem:[%s1694_s1 + $0x14] ss:$8 sps:$4 sm:$0xff]  }
   0x2   :  { %435 = vmatprep.subr.bf16.mxu0 %v1122_v0  ;;  %v1127_v3 = vld [vmem:[%s1694_s1 + $0x10] ss:$8 sps:$4 sm:$0xff]   ;;  %v1128_v4 = vld [vmem:[%s1694_s1 + $0x24] ss:$8 sps:$4 sm:$0xff]   ;;  %v1130_v5 = vld [vmem:[%s1694_s1 + $0x20] ss:$8 sps:$4 sm:$0xff]  }
   0x3   :  { %436 = vmatpush1.bf16.msra.mxu0 %v1124_v1  ;;  %v1131_v6 = vld [vmem:[%s1694_s1 + $0x34] ss:$8 sps:$4 sm:$0xff]   ;;  %v1133_v7 = vld [vmem:[%s1694_s1 + $0x30] ss:$8 sps:$4 sm:$0xff]   ;;  %v1134_v8 = vld [vmem:[%s1694_s1 + $0x44] ss:$8 sps:$4 sm:$0xff]  }
   0x4   :  { %437 = vmatprep.subr.bf16.mxu0 %v1125_v2  ;;  %v1136_v9 = vld [vmem:[%s1694_s1 + $0x40] ss:$8 sps:$4 sm:$0xff]   ;;  %v1137_v10 = vld [vmem:[%s1694_s1 + $0x54] ss:$8 sps:$4 sm:$0xff]   ;;  %v1139_v11 = vld [vmem:[%s1694_s1 + $0x50] ss:$8 sps:$4 sm:$0xff]  }
   0x5   :  { %v1140_v12 = vld [vmem:[%s1694_s1 + $0x64] ss:$8 sps:$4 sm:$0xff]   ;;  %v1142_v16 = vld [vmem:[%s1694_s1 + $0x60] ss:$8 sps:$4 sm:$0xff]   ;;  %v1143_v17 = vld [vmem:[%s1694_s1 + $0x74] ss:$8 sps:$4 sm:$0xff]  }
   0x6   :  { %v28_v13 = vld [vmem:[%s1695_s0 + $0x8] sm:$0xff]  ;;  %v1145_v18 = vld [vmem:[%s1694_s1 + $0x70] ss:$8 sps:$4 sm:$0xff]   ;;  %v1149_v21 = vld [vmem:[%s1694_s1 + $0x94] ss:$8 sps:$4 sm:$0xff]  }
   0x7   :  { %438 = vmatpush1.bf16.msra.mxu0 %v1127_v3  ;;  %v32_v14 = vld [vmem:[%s1695_s0 + $0x28] sm:$0xff]  ;;  %v1151_v22 = vld [vmem:[%s1694_s1 + $0x90] ss:$8 sps:$4 sm:$0xff]   ;;  %v1155_v25 = vld [vmem:[%s1694_s1 + $0xb4] ss:$8 sps:$4 sm:$0xff]  }
   0x8   :  { %439 = vmatprep.subr.bf16.mxu0 %v1128_v4  ;;  %v36_v15 = vpack.c.bf16 %v32_v14, %v28_v13  ;;  %v1146_v19 = vld [vmem:[%s1694_s1 + $0x84] ss:$8 sps:$4 sm:$0xff]   ;;  %v1148_v20 = vld [vmem:[%s1694_s1 + $0x80] ss:$8 sps:$4 sm:$0xff]   ;;  %v1157_v26 = vld [vmem:[%s1694_s1 + $0xb0] ss:$8 sps:$4 sm:$0xff]  }
   0x9   :  { %v1152_v23 = vld [vmem:[%s1694_s1 + $0xa4] ss:$8 sps:$4 sm:$0xff]   ;;  %v1154_v24 = vld [vmem:[%s1694_s1 + $0xa0] ss:$8 sps:$4 sm:$0xff]   ;;  %v1221_v31 = vld [vmem:[%s1696_s3 + $0x14] ss:$8 sps:$4 sm:$0xff]  }
   0xa   :  { %467 = vmatprep.mubr.bf16.mxu0 %v36_v15  ;;  %v1158_v27 = vld [vmem:[%s1694_s1 + $0xc4] ss:$8 sps:$4 sm:$0xff]   ;;  %v1220_v29 = vld [vmem:[%s1696_s3] ss:$8 sps:$4 sm:$0xff]   ;;  %v1161_v32 = vld [vmem:[%s1694_s1 + $0xd4] ss:$8 sps:$4 sm:$0xff]  }
   0xb   :  { %440 = vmatpush1.bf16.msra.mxu0 %v1130_v5  ;;  %v1218_v28 = vld [vmem:[%s1696_s3 + $0x4] ss:$8 sps:$4 sm:$0xff]   ;;  %v1160_v30 = vld [vmem:[%s1694_s1 + $0xc0] ss:$8 sps:$4 sm:$0xff]   ;;  %v1223_v33 = vld [vmem:[%s1696_s3 + $0x10] ss:$8 sps:$4 sm:$0xff]  }
   0xc   :  { %441 = vmatprep.subr.bf16.mxu0 %v1131_v6  ;;  %731 = vmatprep.subr.bf16.mxu1 %v1218_v28  ;;  %v1224_v34 = vld [vmem:[%s1696_s3 + $0x24] ss:$8 sps:$4 sm:$0xff]   ;;  %v1163_v35 = vld [vmem:[%s1694_s1 + $0xd0] ss:$8 sps:$4 sm:$0xff]   ;;  %v1226_v37 = vld [vmem:[%s1696_s3 + $0x20] ss:$8 sps:$4 sm:$0xff]  }
   0xd   :  { %732 = vmatpush1.bf16.msra.mxu1 %v1220_v29  ;;  %v1164_v36 = vld [vmem:[%s1694_s1 + $0xe4] ss:$8 sps:$4 sm:$0xff]   ;;  %v1227_v38 = vld [vmem:[%s1696_s3 + $0x34] ss:$8 sps:$4 sm:$0xff]   ;;  %v1166_v39 = vld [vmem:[%s1694_s1 + $0xe0] ss:$8 sps:$4 sm:$0xff]  }
   0xe   :  { %733 = vmatprep.subr.bf16.mxu1 %v1221_v31  ;;  %v1167_v40 = vld [vmem:[%s1694_s1 + $0xf4] ss:$8 sps:$4 sm:$0xff]   ;;  %v1169_v41 = vld [vmem:[%s1694_s1 + $0xf0] ss:$8 sps:$4 sm:$0xff]   ;;  %v1172_v43 = vld [vmem:[%s1694_s1 + $0x104] ss:$8 sps:$4 sm:$0xff]  }
   0xf   :  { %442 = vmatpush1.bf16.msra.mxu0 %v1133_v7  ;;  %v1229_v42 = vld [vmem:[%s1696_s3 + $0x30] ss:$8 sps:$4 sm:$0xff]   ;;  %v27_v44 = vld [vmem:[%s1695_s0] sm:$0xff]  ;;  %v1233_v51 = vld [vmem:[%s1696_s3 + $0x54] ss:$8 sps:$4 sm:$0xff]  }
  0x10   :  { %443 = vmatprep.subr.bf16.mxu0 %v1134_v8  ;;  %v1230_v45 = vld [vmem:[%s1696_s3 + $0x44] ss:$8 sps:$4 sm:$0xff]   ;;  %v30_v47 = vld [vmem:[%s1695_s0 + $0x18] sm:$0xff]  ;;  %v1232_v49 = vld [vmem:[%s1696_s3 + $0x40] ss:$8 sps:$4 sm:$0xff]  }
  0x11   :  { %734 = vmatpush1.bf16.msra.mxu1 %v1223_v33  ;;  %v31_v46 = vld [vmem:[%s1695_s0 + $0x20] sm:$0xff]  ;;  %v34_v48 = vld [vmem:[%s1695_s0 + $0x38] sm:$0xff] }
  0x12   :  { %735 = vmatprep.subr.bf16.mxu1 %v1224_v34  ;;  %v35_v50 = vpack.c.bf16 %v31_v46, %v27_v44  ;;  %v1170_v52 = vld [vmem:[%s1694_s1 + $0x100] ss:$8 sps:$4 sm:$0xff]   ;;  %v1175_v53 = vld [vmem:[%s1694_s1 + $0x114] ss:$8 sps:$4 sm:$0xff]   ;;  %v38_v54 = vpack.c.bf16 %v34_v48, %v30_v47  ;;  %v1235_v55 = vld [vmem:[%s1696_s3 + $0x50] ss:$8 sps:$4 sm:$0xff]  }
  0x13   :  { %444 = vmatpush1.bf16.msra.mxu0 %v1136_v9  ;;  %v1236_v56 = vld [vmem:[%s1696_s3 + $0x64] ss:$8 sps:$4 sm:$0xff]   ;;  %v1173_v57 = vld [vmem:[%s1694_s1 + $0x110] ss:$8 sps:$4 sm:$0xff]   ;;  %v1238_v59 = vld [vmem:[%s1696_s3 + $0x60] ss:$8 sps:$4 sm:$0xff]  }
  0x14   :  { %445 = vmatprep.subr.bf16.mxu0 %v1137_v10  ;;  %v1178_v58 = vld [vmem:[%s1694_s1 + $0x124] ss:$8 sps:$4 sm:$0xff]   ;;  %v1239_v60 = vld [vmem:[%s1696_s3 + $0x74] ss:$8 sps:$4 sm:$0xff]   ;;  %v1176_v61 = vld [vmem:[%s1694_s1 + $0x120] ss:$8 sps:$4 sm:$0xff]  }
  0x15   :  { %736 = vmatpush1.bf16.msra.mxu1 %v1226_v37  ;;  %v1181_v62 = vld [vmem:[%s1694_s1 + $0x134] ss:$8 sps:$4 sm:$0xff]   ;;  %v1241_v63 = vld [vmem:[%s1696_s3 + $0x70] ss:$8 sps:$4 sm:$0xff]   ;;  %v1242_v0 = vld [vmem:[%s1696_s3 + $0x84] ss:$8 sps:$4 sm:$0xff]  }
  0x16   :  { %737 = vmatprep.subr.bf16.mxu1 %v1227_v38  ;;  %v1179_v1 = vld [vmem:[%s1694_s1 + $0x130] ss:$8 sps:$4 sm:$0xff]   ;;  %v1184_v2 = vld [vmem:[%s1694_s1 + $0x144] ss:$8 sps:$4 sm:$0xff]   ;;  %v1244_v3 = vld [vmem:[%s1696_s3 + $0x80] ss:$8 sps:$4 sm:$0xff]  }
  0x17   :  { %446 = vmatpush1.bf16.msra.mxu0 %v1139_v11  ;;  %v1245_v4 = vld [vmem:[%s1696_s3 + $0x94] ss:$8 sps:$4 sm:$0xff]   ;;  %v1182_v5 = vld [vmem:[%s1694_s1 + $0x140] ss:$8 sps:$4 sm:$0xff]   ;;  %v1247_v7 = vld [vmem:[%s1696_s3 + $0x90] ss:$8 sps:$4 sm:$0xff]  }
  0x18   :  { %447 = vmatprep.subr.bf16.mxu0 %v1140_v12  ;;  %v1187_v6 = vld [vmem:[%s1694_s1 + $0x154] ss:$8 sps:$4 sm:$0xff]   ;;  %v1248_v8 = vld [vmem:[%s1696_s3 + $0xa4] ss:$8 sps:$4 sm:$0xff]   ;;  %v1185_v9 = vld [vmem:[%s1694_s1 + $0x150] ss:$8 sps:$4 sm:$0xff]  }
  0x19   :  { %738 = vmatpush1.bf16.msra.mxu1 %v1229_v42  ;;  %v1190_v10 = vld [vmem:[%s1694_s1 + $0x164] ss:$8 sps:$4 sm:$0xff]   ;;  %v1250_v11 = vld [vmem:[%s1696_s3 + $0xa0] ss:$8 sps:$4 sm:$0xff]   ;;  %v1251_v12 = vld [vmem:[%s1696_s3 + $0xb4] ss:$8 sps:$4 sm:$0xff]  }
  0x1a   :  { %739 = vmatprep.subr.bf16.mxu1 %v1230_v45  ;;  %v1188_v13 = vld [vmem:[%s1694_s1 + $0x160] ss:$8 sps:$4 sm:$0xff]   ;;  %v1193_v14 = vld [vmem:[%s1694_s1 + $0x174] ss:$8 sps:$4 sm:$0xff]   ;;  %v1253_v15 = vld [vmem:[%s1696_s3 + $0xb0] ss:$8 sps:$4 sm:$0xff]   ;;  %v105_v45 = vlaneseq }
  0x1b   :  { %448 = vmatpush1.bf16.msra.mxu0 %v1142_v16  ;;  %v1254_v16 = vld [vmem:[%s1696_s3 + $0xc4] ss:$8 sps:$4 sm:$0xff]   ;;  %v1206_v29 = vld [vmem:[%s1694_s1 + $0x1c0] ss:$8 sps:$4 sm:$0xff]   ;;  %v1209_v31 = vld [vmem:[%s1694_s1 + $0x1d0] ss:$8 sps:$4 sm:$0xff]  }
  0x1c   :  { %449 = vmatprep.subr.bf16.mxu0 %v1143_v17  ;;  %v1191_v17 = vld [vmem:[%s1694_s1 + $0x170] ss:$8 sps:$4 sm:$0xff]   ;;  %v1208_v28 = vld [vmem:[%s1694_s1 + $0x1c4] ss:$8 sps:$4 sm:$0xff]   ;;  %v1212_v33 = vld [vmem:[%s1694_s1 + $0x1e0] ss:$8 sps:$4 sm:$0xff]  }
  0x1d   :  { %740 = vmatpush1.bf16.msra.mxu1 %v1232_v49  ;;  %v1217_v34 = vld [vmem:[%s1694_s1 + $0x1f4] ss:$8 sps:$4 sm:$0xff]   ;;  %v1266_v44 = vld [vmem:[%s1697_s5 + $0x40] sm:$0xff]   ;;  %v106_v46 = vshrl.u32 %v105_v45, 7 }
  0x1e   :  { %741 = vmatprep.subr.bf16.mxu1 %v1233_v51  ;;  %v33_v37 = vld [vmem:[%s1695_s0 + $0x30] sm:$0xff]  ;;  %v103_v48 = vld [vmem:[%s1698_s2] sm:$0x3] }
  0x1f   :  { %450 = vmatpush1.bf16.msra.mxu0 %v1145_v18  ;;  %v1196_v18 = vld [vmem:[%s1694_s1 + $0x184] ss:$8 sps:$4 sm:$0xff]   ;;  %v1263_v42 = vld [vmem:[%s1696_s3 + $0xf4] ss:$8 sps:$4 sm:$0xff]   ;;  %v107_v47 = vsub.s32 0, %v106_v46  ;;  %v111_v49 = vsub.s32 1, %v106_v46 }
  0x20   :  { %451 = vmatprep.subr.bf16.mxu0 %v1146_v19  ;;  %v1256_v19 = vld [vmem:[%s1696_s3 + $0xc0] ss:$8 sps:$4 sm:$0xff]  }
  0x21   :  { %742 = vmatpush1.bf16.msra.mxu1 %v1235_v55  ;;  %v112_v51 = vrot.slane %v103_v48, %v111_v49 }
  0x22   :  { %743 = vmatprep.subr.bf16.mxu1 %v1236_v56 }
  0x23   :  { %452 = vmatpush1.bf16.msra.mxu0 %v1148_v20  ;;  %v1257_v20 = vld [vmem:[%s1696_s3 + $0xd4] ss:$8 sps:$4 sm:$0xff]  }
  0x24   :  { %453 = vmatprep.subr.bf16.mxu0 %v1149_v21  ;;  %v1194_v21 = vld [vmem:[%s1694_s1 + $0x180] ss:$8 sps:$4 sm:$0xff]  }
  0x25   :  { %744 = vmatpush1.bf16.msra.mxu1 %v1238_v59 }
  0x26   :  { %745 = vmatprep.subr.bf16.mxu1 %v1239_v60 }
  0x27   :  { %454 = vmatpush1.bf16.msra.mxu0 %v1151_v22  ;;  %v1199_v22 = vld [vmem:[%s1694_s1 + $0x194] ss:$8 sps:$4 sm:$0xff]  }
  0x28   :  { %455 = vmatprep.subr.bf16.mxu0 %v1152_v23  ;;  %v1197_v23 = vld [vmem:[%s1694_s1 + $0x190] ss:$8 sps:$4 sm:$0xff]  }
  0x29   :  { %746 = vmatpush1.bf16.msra.mxu1 %v1241_v63 }
  0x2a   :  { %747 = vmatprep.subr.bf16.mxu1 %v1242_v0 }
  0x2b   :  { %456 = vmatpush1.bf16.msra.mxu0 %v1154_v24  ;;  %v1202_v24 = vld [vmem:[%s1694_s1 + $0x1a4] ss:$8 sps:$4 sm:$0xff]  }
  0x2c   :  { %457 = vmatprep.subr.bf16.mxu0 %v1155_v25  ;;  %v1200_v25 = vld [vmem:[%s1694_s1 + $0x1a0] ss:$8 sps:$4 sm:$0xff]  }
  0x2d   :  { %748 = vmatpush1.bf16.msra.mxu1 %v1244_v3  ;;  %v1268_v3 = vld [vmem:[%s1697_s5 + $0x48] sm:$0xff]  }
  0x2e   :  { %749 = vmatprep.subr.bf16.mxu1 %v1245_v4  ;;  %v1269_v4 = vld [vmem:[%s1697_s5 + $0x8] sm:$0xff]  }
  0x2f   :  { %458 = vmatpush1.bf16.msra.mxu0 %v1157_v26  ;;  %v1205_v26 = vld [vmem:[%s1694_s1 + $0x1b4] ss:$8 sps:$4 sm:$0xff]  }
  0x30   :  { %459 = vmatprep.subr.bf16.mxu0 %v1158_v27  ;;  %v1203_v27 = vld [vmem:[%s1694_s1 + $0x1b0] ss:$8 sps:$4 sm:$0xff]  }
  0x31   :  { %750 = vmatpush1.bf16.msra.mxu1 %v1247_v7  ;;  %v1272_v7 = vld [vmem:[%s1697_s5 + $0x58] sm:$0xff]  }
  0x32   :  { %751 = vmatprep.subr.bf16.mxu1 %v1248_v8  ;;  %v1273_v8 = vld [vmem:[%s1697_s5 + $0x18] sm:$0xff]  }
  0x33   :  { %460 = vmatpush1.bf16.msra.mxu0 %v1160_v30  ;;  %v1211_v30 = vld [vmem:[%s1694_s1 + $0x1d4] ss:$8 sps:$4 sm:$0xff]  }
  0x34   :  { %461 = vmatprep.subr.bf16.mxu0 %v1161_v32  ;;  %v1214_v32 = vld [vmem:[%s1694_s1 + $0x1e4] ss:$8 sps:$4 sm:$0xff]  }
  0x35   :  { %752 = vmatpush1.bf16.msra.mxu1 %v1250_v11  ;;  %v1276_v11 = vld [vmem:[%s1697_s5 + $0x68] sm:$0xff]  }
  0x36   :  { %753 = vmatprep.subr.bf16.mxu1 %v1251_v12  ;;  %v1277_v12 = vld [vmem:[%s1697_s5 + $0x28] sm:$0xff]  }
  0x37   :  { %462 = vmatpush1.bf16.msra.mxu0 %v1163_v35  ;;  %v1215_v35 = vld [vmem:[%s1694_s1 + $0x1f0] ss:$8 sps:$4 sm:$0xff]  }
  0x38   :  { %463 = vmatprep.subr.bf16.mxu0 %v1164_v36  ;;  %v29_v36 = vld [vmem:[%s1695_s0 + $0x10] sm:$0xff] }
  0x39   :  { %754 = vmatpush1.bf16.msra.mxu1 %v1253_v15  ;;  %v37_v38 = vpack.c.bf16 %v33_v37, %v29_v36  ;;  %v1280_v15 = vld [vmem:[%s1697_s5 + $0x78] sm:$0xff]  }
  0x3a   :  { %755 = vmatprep.subr.bf16.mxu1 %v1254_v16  ;;  %v1281_v16 = vld [vmem:[%s1697_s5 + $0x38] sm:$0xff]  }
  0x3b   :  { %464 = vmatpush1.bf16.msra.mxu0 %v1166_v39  ;;  %v1259_v39 = vld [vmem:[%s1696_s3 + $0xd0] ss:$8 sps:$4 sm:$0xff]  }
  0x3c   :  { %465 = vmatprep.subr.bf16.mxu0 %v1167_v40  ;;  %v1260_v40 = vld [vmem:[%s1696_s3 + $0xe4] ss:$8 sps:$4 sm:$0xff]  }
  0x3d   :  { %756 = vmatpush1.bf16.msra.mxu1 %v1256_v19 }
  0x3e   :  { %757 = vmatprep.subr.bf16.mxu1 %v1257_v20 }
  0x3f   :  { %466 = vmatpush1.bf16.msra.mxu0 %v1169_v41  ;;  %v1262_v41 = vld [vmem:[%s1696_s3 + $0xe0] ss:$8 sps:$4 sm:$0xff]  }
  0x40   :  { %478 = vmatprep.subr.bf16.mxu0 %v1172_v43  ;;  %v1265_v43 = vld [vmem:[%s1696_s3 + $0xf0] ss:$8 sps:$4 sm:$0xff]  }
  0x41   :  { %758 = vmatpush1.bf16.msra.mxu1 %v1259_v39 }
  0x42   :  { %468 = vmatmul.mubr.bf16.vlgmr.msra.gmra.mrb[0].mxu0 %v35_v50  ;;  %759 = vmatprep.subr.bf16.mxu1 %v1260_v40  ;;  %v108_v50 = vrot.slane %v103_v48, %v107_v47 }
  0x43   :  { %479 = vmatpush1.bf16.msra.mxu0 %v1170_v52  ;;  %510 = vmatprep.mubr.bf16.mxu0 %v38_v54 }
  0x44   :  { %480 = vmatprep.subr.bf16.mxu0 %v1175_v53 }
  0x45   :  { %760 = vmatpush1.bf16.msra.mxu1 %v1262_v41 }
  0x46   :  { %761 = vmatprep.subr.bf16.mxu1 %v1263_v42 }
  0x47   :  { %481 = vmatpush1.bf16.msra.mxu0 %v1173_v57 }
  0x48   :  { %482 = vmatprep.subr.bf16.mxu0 %v1178_v58 }
  0x49   :  { %762 = vmatpush1.bf16.msra.mxu1 %v1265_v43 }
  0x4a   :  { %1092 = vmatprep.subr.bf16.mxu1 %v1266_v44 }
  0x4b   :  { %483 = vmatpush1.bf16.msra.mxu0 %v1176_v61 }
  0x4c   :  { %484 = vmatprep.subr.bf16.mxu0 %v1181_v62 }
  0x4f   :  { %485 = vmatpush1.bf16.msra.mxu0 %v1179_v1 }
  0x50   :  { %486 = vmatprep.subr.bf16.mxu0 %v1184_v2  ;;  %v1267_v2 = vld [vmem:[%s1697_s5] sm:$0xff]  }
  0x53   :  { %487 = vmatpush1.bf16.msra.mxu0 %v1182_v5  ;;  %v1270_v5 = vld [vmem:[%s1697_s5 + $0x50] sm:$0xff]  }
  0x54   :  { %488 = vmatprep.subr.bf16.mxu0 %v1187_v6  ;;  %v1271_v6 = vld [vmem:[%s1697_s5 + $0x10] sm:$0xff]  }
  0x57   :  { %489 = vmatpush1.bf16.msra.mxu0 %v1185_v9  ;;  %v1274_v9 = vld [vmem:[%s1697_s5 + $0x60] sm:$0xff]  }
  0x58   :  { %490 = vmatprep.subr.bf16.mxu0 %v1190_v10  ;;  %v1275_v10 = vld [vmem:[%s1697_s5 + $0x20] sm:$0xff]  }
  0x5b   :  { %491 = vmatpush1.bf16.msra.mxu0 %v1188_v13  ;;  %v1278_v13 = vld [vmem:[%s1697_s5 + $0x70] sm:$0xff]  }
  0x5c   :  { %492 = vmatprep.subr.bf16.mxu0 %v1193_v14  ;;  %v1279_v14 = vld [vmem:[%s1697_s5 + $0x30] sm:$0xff]  }
  0x5f   :  { %493 = vmatpush1.bf16.msra.mxu0 %v1191_v17  ;;  %v559_v17 = vld [vmem:[%s1699_s4] sm:$0x3] }
  0x60   :  { %494 = vmatprep.subr.bf16.mxu0 %v1196_v18  ;;  %v564_v18 = vrot.slane %v559_v17, %v107_v47  ;;  %v568_v19 = vrot.slane %v559_v17, %v111_v49 }
  0x63   :  { %495 = vmatpush1.bf16.msra.mxu0 %v1194_v21 }
  0x64   :  { %496 = vmatprep.subr.bf16.mxu0 %v1199_v22 }
  0x67   :  { %497 = vmatpush1.bf16.msra.mxu0 %v1197_v23 }
  0x68   :  { %498 = vmatprep.subr.bf16.mxu0 %v1202_v24 }
  0x6b   :  { %499 = vmatpush1.bf16.msra.mxu0 %v1200_v25 }
  0x6c   :  { %500 = vmatprep.subr.bf16.mxu0 %v1205_v26 }
  0x6f   :  { %501 = vmatpush1.bf16.msra.mxu0 %v1203_v27 }
  0x70   :  { %502 = vmatprep.subr.bf16.mxu0 %v1208_v28 }
  0x73   :  { %503 = vmatpush1.bf16.msra.mxu0 %v1206_v29 }
  0x74   :  { %504 = vmatprep.subr.bf16.mxu0 %v1211_v30 }
  0x77   :  { %505 = vmatpush1.bf16.msra.mxu0 %v1209_v31 }
  0x78   :  { %506 = vmatprep.subr.bf16.mxu0 %v1214_v32 }
  0x7b   :  { %507 = vmatpush1.bf16.msra.mxu0 %v1212_v33 }
  0x7c   :  { %508 = vmatprep.subr.bf16.mxu0 %v1217_v34 }
  0x7f   :  { %509 = vmatpush1.bf16.msra.mxu0 %v1215_v35 }
  0x82   :  { %511 = vmatmul.mubr.bf16.vlgmr.msra.gmra.mrb[0].mxu0 %v37_v38  ;;  %v1066_v38 = vld [vmem:[%s1700_s6] ss:$0 sm:$0xff] }
 0x155   :  { %v512_v52 = vpop.f32.mrb[0].mxu0 }
 0x156   :  { %v1114_v53 = vadd.f32 %v512_v52, %v108_v50  ;;  %v514_v54 = vpop.f32.mrb[1].mxu0 }
 0x157   :  { %v1115_v55 = vadd.f32 %v514_v54, %v112_v51  ;;  %v516_v56 = vpop.f32.mrb[2].mxu0 }
 0x158   :  { %v1116_v57 = vadd.f32 %v516_v56, %v108_v50  ;;  %v518_v58 = vpop.f32.mrb[3].mxu0  ;;  %v521_v60 = vmax.f32 %v1114_v53, 0.0 }
 0x159   :  { %v1117_v59 = vadd.f32 %v518_v58, %v112_v51  ;;  %v522_v62 = vmax.f32 %v1115_v55, 0.0 }
 0x15a   :  { %v523_v61 = vmax.f32 %v1116_v57, 0.0 }
 0x15b   :  { %v524_v63 = vmax.f32 %v1117_v59, 0.0 }
 0x15c   :  { %v525_v0 = vpack.c.bf16 %v523_v61, %v521_v60 }
 0x15d   :  { %v526_v1 = vpack.c.bf16 %v524_v63, %v522_v62 }
 0x15f   :  { %763 = vmatprep.mubr.bf16.mxu1 %v526_v1 }
 0x160   :  { %764 = vmatmul.mubr.bf16.vlgmr.msra.gmra.mrb[0].mxu1 %v525_v0 }
 0x161   :  { %1093 = vmatpush3.bf16.msra.mxu1 %v1267_v2 }
 0x162   :  { %1094 = vmatprep.subr.bf16.mxu1 %v1268_v3 }
 0x165   :  { %1095 = vmatpush3.bf16.msra.mxu1 %v1269_v4 }
 0x166   :  { %1096 = vmatprep.subr.bf16.mxu1 %v1270_v5 }
 0x169   :  { %1097 = vmatpush3.bf16.msra.mxu1 %v1271_v6 }
 0x16a   :  { %1098 = vmatprep.subr.bf16.mxu1 %v1272_v7 }
 0x16d   :  { %1099 = vmatpush3.bf16.msra.mxu1 %v1273_v8 }
 0x16e   :  { %1100 = vmatprep.subr.bf16.mxu1 %v1274_v9 }
 0x171   :  { %1101 = vmatpush3.bf16.msra.mxu1 %v1275_v10 }
 0x172   :  { %1102 = vmatprep.subr.bf16.mxu1 %v1276_v11 }
 0x175   :  { %1103 = vmatpush3.bf16.msra.mxu1 %v1277_v12 }
 0x176   :  { %1104 = vmatprep.subr.bf16.mxu1 %v1278_v13 }
 0x179   :  { %1105 = vmatpush3.bf16.msra.mxu1 %v1279_v14 }
 0x17a   :  { %1106 = vmatprep.subr.bf16.mxu1 %v1280_v15 }
 0x17d   :  { %1107 = vmatpush3.bf16.msra.mxu1 %v1281_v16 }
 0x233   :  { %v765_v20 = vpop.f32.mrb[0].mxu1 }
 0x234   :  { %v766_v21 = vadd.f32 %v765_v20, %v564_v18  ;;  %v767_v22 = vpop.f32.mrb[1].mxu1 }
 0x235   :  { %v768_v23 = vadd.f32 %v767_v22, %v568_v19  ;;  %v769_v24 = vpop.f32.mrb[2].mxu1 }
 0x236   :  { %v770_v25 = vadd.f32 %v769_v24, %v564_v18  ;;  %v771_v26 = vpop.f32.mrb[3].mxu1  ;;  %v774_v28 = vmax.f32 %v766_v21, 0.0 }
 0x237   :  { %v772_v27 = vadd.f32 %v771_v26, %v568_v19  ;;  %v775_v30 = vmax.f32 %v768_v23, 0.0 }
 0x238   :  { %v776_v29 = vmax.f32 %v770_v25, 0.0 }
 0x239   :  { %v777_v31 = vmax.f32 %v772_v27, 0.0 }
 0x23a   :  { %v778_v32 = vpack.c.bf16 %v776_v29, %v774_v28 }
 0x23b   :  { %v779_v33 = vpack.c.bf16 %v777_v31, %v775_v30 }
 0x23d   :  { %947 = vmatprep.mubr.bf16.mxu1 %v779_v33 }
 0x23e   :  { %948 = vmatmul.mubr.bf16.vlgmr.msra.gmra.mrb[4].mxu1 %v778_v32 }
 0x311   :  { %v1108_v34 = vpop.f32.mrb[4].mxu1 }
 0x312   :  { %v1109_v35 = vpop.f32.mrb[5].mxu1 }
 0x313   :  { %v1110_v36 = vadd.f32 %v1109_v35, %v1108_v34  ;;  %v1111_v37 = vpop.f32.mrb[6].mxu1 }
 0x314   :  { %v1112_v39 = vpop.f32.mrb[7].mxu1 }
 0x315   :  { %v1113_v40 = vadd.f32 %v1112_v39, %v1111_v37  ;;  %v950_v41 = vadd.f32 %v1110_v36, %v1066_v38 }
 0x317   :  { %v953_v42 = vadd.f32 %v1113_v40, %v1066_v38 }
 0x319   :  { %v1090_v43 = vpack.c.bf16 %v953_v42, %v950_v41 }
 0x31b   :  { %1091 = vst [vmem:[%s1701_s7] sm:$0xff] %v1090_v43  }

// kernel: sst_ad_prerel_forward.4
= control target key start
LH: loop header
LB: loop body
LE: loop exit
PB: predicated region body
PF: predicated region fallthrough
CT: control target
= control target key end

     0   :  { %v1482_v0 = vmov 0.0   ;;  %s1530_s24 = smov 0   ;;  %s1902_s0 = inlined_call_operand.vmem [shape: bf16[8,2,128], index: 0, kind: input, shape index: {}]   ;;  %s1903_s1 = inlined_call_operand.vmem [shape: bf16[128,768], index: 1, kind: input, shape index: {}]   ;;  %s1904_s2 = inlined_call_operand.vmem [shape: f32[1,768], index: 2, kind: input, shape index: {}]   ;;  %s1905_s3 = inlined_call_operand.vmem [shape: bf16[128,384], index: 3, kind: input, shape index: {}]   ;;  %s1906_s4 = inlined_call_operand.vmem [shape: f32[1,384], index: 4, kind: input, shape index: {}]   ;;  %s1907_s5 = inlined_call_operand.vmem [shape: bf16[128,384], index: 5, kind: input, shape index: {}]   ;;  %s1908_s6 = inlined_call_operand.vmem [shape: f32[1,384], index: 6, kind: input, shape index: {}]   ;;  %s1909_s7 = inlined_call_operand.vmem [shape: f32[8,2,256], index: 7, kind: output, shape index: {}]  }
   0x1   :  { %31 = vst [vmem:[#allocation2] sm:$0xf] %v1482_v0 }
   0x8   :  { %v1102_v1 = vld.sshfl [vmem:[#allocation2] sm:$0x33 pattern:$0x76325410]  }
   0x9   :  { %v41_v2 = vcombine.high %v1102_v1, %v1102_v1  }
   0xa LB: > { %v1302_v3 = vld [vmem:[%s1903_s1 + $0x4] ss:$24 sps:$4 sm:$0xff]   ;;  %v1483_v5 = vmov 0   ;;  %v1306_v6 = vld [vmem:[%s1903_s1] ss:$24 sps:$4 sm:$0xff]   ;;  %s52_s25 = scalar_lea.vmem %s1902_s0, %s1480_s24  ;;  %v1484_v40 = vmov 0.0   ;;  %s1480_s24 = sphi %s1530_s24, %s49_s24   ;;  %v1476_v1 = vphi %v1102_v1, %v1035_v1   ;;  %v1472_v2 = vphi %v41_v2, %v1056_v2  }
   0xb   : > { %v1304_v4 = vld [vmem:[%s1903_s1 + $0xc] ss:$24 sps:$4 sm:$0xff]   ;;  %406 = vmatprep.mubr.bf16.mxu0 %v1483_v5  ;;  %447 = vmatprep.mubr.bf16.mxu1 %v1483_v5  ;;  %v1307_v7 = vld [vmem:[%s1903_s1 + $0x8] ss:$24 sps:$4 sm:$0xff]   ;;  %v1310_v9 = vld [vmem:[%s1903_s1 + $0x3c] ss:$24 sps:$4 sm:$0xff]  }
   0xc   : > { %374 = vmatprep.subr.bf16.mxu0 %v1302_v3  ;;  %415 = vmatprep.subr.bf16.mxu1 %v1304_v4  ;;  %v1308_v8 = vld [vmem:[%s1903_s1 + $0x34] ss:$24 sps:$4 sm:$0xff]   ;;  %v1312_v10 = vld [vmem:[%s1903_s1 + $0x30] ss:$24 sps:$4 sm:$0xff]   ;;  %v1314_v12 = vld [vmem:[%s1903_s1 + $0x64] ss:$24 sps:$4 sm:$0xff]   ;;  %v1744_v4 = vpack.c.bf16 %v1476_v1, %v1476_v1 }
   0xd   : > { %375 = vmatpush1.bf16.msra.mxu0 %v1306_v6  ;;  %416 = vmatpush1.bf16.msra.mxu1 %v1307_v7  ;;  %v1313_v11 = vld [vmem:[%s1903_s1 + $0x38] ss:$24 sps:$4 sm:$0xff]   ;;  %v1316_v13 = vld [vmem:[%s1903_s1 + $0x6c] ss:$24 sps:$4 sm:$0xff]   ;;  %v1319_v15 = vld [vmem:[%s1903_s1 + $0x68] ss:$24 sps:$4 sm:$0xff]  }
   0xe   : > { %376 = vmatprep.subr.bf16.mxu0 %v1308_v8  ;;  %417 = vmatprep.subr.bf16.mxu1 %v1310_v9  ;;  %v1318_v14 = vld [vmem:[%s1903_s1 + $0x60] ss:$24 sps:$4 sm:$0xff]   ;;  %v1320_v16 = vld [vmem:[%s1903_s1 + $0x94] ss:$24 sps:$4 sm:$0xff]   ;;  %v1324_v18 = vld [vmem:[%s1903_s1 + $0x90] ss:$24 sps:$4 sm:$0xff]  }
   0xf   : > { %v1322_v17 = vld [vmem:[%s1903_s1 + $0x9c] ss:$24 sps:$4 sm:$0xff]   ;;  %v1325_v19 = vld [vmem:[%s1903_s1 + $0x98] ss:$24 sps:$4 sm:$0xff]   ;;  %v1328_v21 = vld [vmem:[%s1903_s1 + $0xcc] ss:$24 sps:$4 sm:$0xff]  }
  0x10   : > { %v1326_v20 = vld [vmem:[%s1903_s1 + $0xc4] ss:$24 sps:$4 sm:$0xff]   ;;  %v1330_v22 = vld [vmem:[%s1903_s1 + $0xc0] ss:$24 sps:$4 sm:$0xff]   ;;  %v1332_v24 = vld [vmem:[%s1903_s1 + $0xf4] ss:$24 sps:$4 sm:$0xff]  }
  0x11   : > { %377 = vmatpush1.bf16.msra.mxu0 %v1312_v10  ;;  %418 = vmatpush1.bf16.msra.mxu1 %v1313_v11  ;;  %v1331_v23 = vld [vmem:[%s1903_s1 + $0xc8] ss:$24 sps:$4 sm:$0xff]   ;;  %v1334_v25 = vld [vmem:[%s1903_s1 + $0xfc] ss:$24 sps:$4 sm:$0xff]   ;;  %v1337_v27 = vld [vmem:[%s1903_s1 + $0xf8] ss:$24 sps:$4 sm:$0xff]  }
  0x12   : > { %378 = vmatprep.subr.bf16.mxu0 %v1314_v12  ;;  %419 = vmatprep.subr.bf16.mxu1 %v1316_v13  ;;  %v1336_v26 = vld [vmem:[%s1903_s1 + $0xf0] ss:$24 sps:$4 sm:$0xff]   ;;  %v1338_v28 = vld [vmem:[%s1903_s1 + $0x124] ss:$24 sps:$4 sm:$0xff]   ;;  %v1342_v30 = vld [vmem:[%s1903_s1 + $0x120] ss:$24 sps:$4 sm:$0xff]  }
  0x13   : > { %v1340_v29 = vld [vmem:[%s1903_s1 + $0x12c] ss:$24 sps:$4 sm:$0xff]   ;;  %v1343_v31 = vld [vmem:[%s1903_s1 + $0x128] ss:$24 sps:$4 sm:$0xff]   ;;  %v1346_v33 = vld [vmem:[%s1903_s1 + $0x15c] ss:$24 sps:$4 sm:$0xff]  }
  0x14   : > { %v1344_v32 = vld [vmem:[%s1903_s1 + $0x154] ss:$24 sps:$4 sm:$0xff]   ;;  %v1348_v34 = vld [vmem:[%s1903_s1 + $0x150] ss:$24 sps:$4 sm:$0xff]   ;;  %v1649_v38 = vld [vmem:[%s52_s25] sm:$0x1] }
  0x15   : > { %379 = vmatpush1.bf16.msra.mxu0 %v1318_v14  ;;  %420 = vmatpush1.bf16.msra.mxu1 %v1319_v15  ;;  %v1349_v35 = vld [vmem:[%s1903_s1 + $0x158] ss:$24 sps:$4 sm:$0xff]   ;;  %v1352_v36 = vld [vmem:[%s1903_s1 + $0x14] ss:$24 sps:$4 sm:$0xff]   ;;  %v1356_v41 = vld [vmem:[%s1903_s1 + $0x44] ss:$24 sps:$4 sm:$0xff]  }
  0x16   : > { %380 = vmatprep.subr.bf16.mxu0 %v1320_v16  ;;  %421 = vmatprep.subr.bf16.mxu1 %v1322_v17  ;;  %v1350_v37 = vld [vmem:[%s1903_s1 + $0x10] ss:$24 sps:$4 sm:$0xff]   ;;  %v1354_v42 = vld [vmem:[%s1903_s1 + $0x40] ss:$24 sps:$4 sm:$0xff]   ;;  %v1360_v44 = vld [vmem:[%s1903_s1 + $0x74] ss:$24 sps:$4 sm:$0xff]  }
  0x17   : > { %v1353_v39 = vld [vmem:[%s1905_s3 + $0x8] ss:$12 sps:$4 sm:$0xff]   ;;  %v1357_v43 = vld [vmem:[%s1905_s3 + $0x20] ss:$12 sps:$4 sm:$0xff]   ;;  %vm1485_vm0 = vmmov 0   ;;  %s1207_s28 = sshll.u32 %s1480_s24, 2 }
  0x18   : > { %v1358_v45 = vld [vmem:[%s1903_s1 + $0x70] ss:$24 sps:$4 sm:$0xff]   ;;  %v1361_v46 = vld [vmem:[%s1905_s3 + $0x38] ss:$12 sps:$4 sm:$0xff]   ;;  %v1368_v50 = vld [vmem:[%s1903_s1 + $0xd4] ss:$24 sps:$4 sm:$0xff]   ;;  %s1070_s8 = scalar_lea.vmem %s1909_s7, %s1207_s28 }
  0x19   : > { %381 = vmatpush1.bf16.msra.mxu0 %v1324_v18  ;;  %422 = vmatpush1.bf16.msra.mxu1 %v1325_v19  ;;  %v1364_v47 = vld [vmem:[%s1903_s1 + $0xa4] ss:$24 sps:$4 sm:$0xff]   ;;  %v1362_v48 = vld [vmem:[%s1903_s1 + $0xa0] ss:$24 sps:$4 sm:$0xff]   ;;  %v1366_v51 = vld [vmem:[%s1903_s1 + $0xd0] ss:$24 sps:$4 sm:$0xff]  }
  0x1a   : > { %382 = vmatprep.subr.bf16.mxu0 %v1326_v20  ;;  %423 = vmatprep.subr.bf16.mxu1 %v1328_v21  ;;  %v1365_v49 = vld [vmem:[%s1905_s3 + $0x50] ss:$12 sps:$4 sm:$0xff]   ;;  %v1369_v52 = vld [vmem:[%s1905_s3 + $0x68] ss:$12 sps:$4 sm:$0xff]   ;;  %v1370_v54 = vld [vmem:[%s1903_s1 + $0x100] ss:$24 sps:$4 sm:$0xff]  }
  0x1b   : > { %v1372_v53 = vld [vmem:[%s1903_s1 + $0x104] ss:$24 sps:$4 sm:$0xff]   ;;  %v1373_v55 = vld [vmem:[%s1905_s3 + $0x80] ss:$12 sps:$4 sm:$0xff]   ;;  %v1374_v57 = vld [vmem:[%s1903_s1 + $0x130] ss:$24 sps:$4 sm:$0xff]  }
  0x1c   : > { %v1376_v56 = vld [vmem:[%s1903_s1 + $0x134] ss:$24 sps:$4 sm:$0xff]   ;;  %v1377_v58 = vld [vmem:[%s1905_s3 + $0x98] ss:$12 sps:$4 sm:$0xff]   ;;  %v1381_v61 = vld [vmem:[%s1905_s3 + $0xb0] ss:$12 sps:$4 sm:$0xff]  }
  0x1d   : > { %383 = vmatpush1.bf16.msra.mxu0 %v1330_v22  ;;  %424 = vmatpush1.bf16.msra.mxu1 %v1331_v23  ;;  %v1380_v59 = vld [vmem:[%s1903_s1 + $0x164] ss:$24 sps:$4 sm:$0xff]   ;;  %v1378_v60 = vld [vmem:[%s1903_s1 + $0x160] ss:$24 sps:$4 sm:$0xff]   ;;  %v1400_v15 = vld [vmem:[%s1905_s3 + $0x48] ss:$12 sps:$4 sm:$0xff]  }
  0x1e   : > { %384 = vmatprep.subr.bf16.mxu0 %v1332_v24  ;;  %425 = vmatprep.subr.bf16.mxu1 %v1334_v25  ;;  %v1384_v62 = vld [vmem:[%s1905_s3 + $0x4] ss:$12 sps:$4 sm:$0xff]   ;;  %v1382_v0 = vld [vmem:[%s1905_s3] ss:$12 sps:$4 sm:$0xff]   ;;  %v1390_v6 = vld [vmem:[%s1905_s3 + $0x1c] ss:$12 sps:$4 sm:$0xff]  }
  0x1f   : > { %v1387_v63 = vld [vmem:[%s1907_s5 + $0x4] ss:$12 sps:$4 sm:$0xff]   ;;  %v1385_v3 = vld [vmem:[%s1907_s5] ss:$12 sps:$4 sm:$0xff]   ;;  %v1393_v7 = vld [vmem:[%s1907_s5 + $0x1c] ss:$12 sps:$4 sm:$0xff]  }
  0x20   : > { %v1388_v8 = vld [vmem:[%s1905_s3 + $0x18] ss:$12 sps:$4 sm:$0xff]   ;;  %v1396_v10 = vld [vmem:[%s1905_s3 + $0x34] ss:$12 sps:$4 sm:$0xff]   ;;  %v1394_v12 = vld [vmem:[%s1905_s3 + $0x30] ss:$12 sps:$4 sm:$0xff]  }
  0x21   : > { %385 = vmatpush1.bf16.msra.mxu0 %v1336_v26  ;;  %426 = vmatpush1.bf16.msra.mxu1 %v1337_v27  ;;  %v1391_v9 = vld [vmem:[%s1907_s5 + $0x18] ss:$12 sps:$4 sm:$0xff]   ;;  %v1399_v11 = vld [vmem:[%s1907_s5 + $0x34] ss:$12 sps:$4 sm:$0xff]   ;;  %v1397_v13 = vld [vmem:[%s1907_s5 + $0x30] ss:$12 sps:$4 sm:$0xff]  }
  0x22   : > { %386 = vmatprep.subr.bf16.mxu0 %v1338_v28  ;;  %427 = vmatprep.subr.bf16.mxu1 %v1340_v29  ;;  %v1402_v14 = vld [vmem:[%s1905_s3 + $0x4c] ss:$12 sps:$4 sm:$0xff]   ;;  %v1403_v16 = vld [vmem:[%s1907_s5 + $0x48] ss:$12 sps:$4 sm:$0xff]   ;;  %v1408_v17 = vld [vmem:[%s1905_s3 + $0x64] ss:$12 sps:$4 sm:$0xff]  }
  0x23   : > { %v1411_v18 = vld [vmem:[%s1907_s5 + $0x64] ss:$12 sps:$4 sm:$0xff]   ;;  %v1406_v19 = vld [vmem:[%s1905_s3 + $0x60] ss:$12 sps:$4 sm:$0xff]   ;;  %v1414_v21 = vld [vmem:[%s1905_s3 + $0x7c] ss:$12 sps:$4 sm:$0xff]  }
  0x24   : > { %v1409_v20 = vld [vmem:[%s1907_s5 + $0x60] ss:$12 sps:$4 sm:$0xff]   ;;  %v1417_v22 = vld [vmem:[%s1907_s5 + $0x7c] ss:$12 sps:$4 sm:$0xff]   ;;  %v1412_v23 = vld [vmem:[%s1905_s3 + $0x78] ss:$12 sps:$4 sm:$0xff]  }
  0x25   : > { %387 = vmatpush1.bf16.msra.mxu0 %v1342_v30  ;;  %428 = vmatpush1.bf16.msra.mxu1 %v1343_v31  ;;  %v1415_v24 = vld [vmem:[%s1907_s5 + $0x78] ss:$12 sps:$4 sm:$0xff]   ;;  %v1420_v25 = vld [vmem:[%s1905_s3 + $0x94] ss:$12 sps:$4 sm:$0xff]   ;;  %v1418_v27 = vld [vmem:[%s1905_s3 + $0x90] ss:$12 sps:$4 sm:$0xff]  }
  0x26   : > { %388 = vmatprep.subr.bf16.mxu0 %v1344_v32  ;;  %429 = vmatprep.subr.bf16.mxu1 %v1346_v33  ;;  %v1423_v26 = vld [vmem:[%s1907_s5 + $0x94] ss:$12 sps:$4 sm:$0xff]   ;;  %v1421_v28 = vld [vmem:[%s1907_s5 + $0x90] ss:$12 sps:$4 sm:$0xff]   ;;  %v1426_v29 = vld [vmem:[%s1905_s3 + $0xac] ss:$12 sps:$4 sm:$0xff]   ;;  %v756_v33 = vpack.c.bf16 %v1472_v2, %v1472_v2 }
  0x27   : > { %v1429_v30 = vld [vmem:[%s1907_s5 + $0xac] ss:$12 sps:$4 sm:$0xff]   ;;  %v1424_v31 = vld [vmem:[%s1905_s3 + $0xa8] ss:$12 sps:$4 sm:$0xff]   ;;  %s49_s24 = sadd.s32 1, %s1480_s24  }
  0x28   : > { %v1427_v32 = vld [vmem:[%s1907_s5 + $0xa8] ss:$12 sps:$4 sm:$0xff]   ;;  %p46_p0 = scmp.ge.s32.totalorder %s49_s24, 8  }
  0x29   : > { %389 = vmatpush1.bf16.msra.mxu0 %v1348_v34  ;;  %430 = vmatpush1.bf16.msra.mxu1 %v1349_v35  ;;  %v1430_v34 = vld [vmem:[%s1907_s5 + $0x8] ss:$12 sps:$4 sm:$0xff]   ;;  %v1431_v35 = vld [vmem:[%s1907_s5 + $0x20] ss:$12 sps:$4 sm:$0xff]  }
  0x2a   : > { %456 = vmatprep.subr.bf16.mxu0 %v1352_v36  ;;  %1226 = vmatprep.subr.bf16.mxu1 %v1484_v40  ;;  %v1432_v36 = vld [vmem:[%s1907_s5 + $0x38] ss:$12 sps:$4 sm:$0xff]  }
  0x2c   : > { %407 = vmatmul.mubr.bf16.vlgmr.msra.gmra.mrb[0].mxu0 %v1649_v38  ;;  %448 = vmatmul.mubr.bf16.vlgmr.msra.gmra.mrb[0].mxu1 %v1649_v38 }
  0x2d   : > { %457 = vmatpush1.bf16.msra.mxu0 %v1350_v37  ;;  %1227 = vmatpush3.bf16.msra.mxu1 %v1353_v39  ;;  %v1433_v37 = vld [vmem:[%s1907_s5 + $0x50] ss:$12 sps:$4 sm:$0xff]   ;;  %v1435_v39 = vld [vmem:[%s1907_s5 + $0x80] ss:$12 sps:$4 sm:$0xff]  }
  0x2e   : > { %458 = vmatprep.subr.bf16.mxu0 %v1356_v41  ;;  %1228 = vmatprep.subr.bf16.mxu1 %v1484_v40  ;;  %v1436_v41 = vld [vmem:[%s1907_s5 + $0x98] ss:$12 sps:$4 sm:$0xff]  }
  0x2f   : > { %488 = vmatprep.mubr.bf16.mxu0 %v1483_v5  ;;  %1242 = vmatprep.mubr.msk.bf16.mxu1 %vm1485_vm0, %v1484_v40 }
  0x31   : > { %459 = vmatpush1.bf16.msra.mxu0 %v1354_v42  ;;  %1229 = vmatpush3.bf16.msra.mxu1 %v1357_v43  ;;  %v1437_v42 = vld [vmem:[%s1907_s5 + $0xb0] ss:$12 sps:$4 sm:$0xff]  }
  0x32   : > { %460 = vmatprep.subr.bf16.mxu0 %v1360_v44  ;;  %1230 = vmatprep.subr.bf16.mxu1 %v1484_v40 }
  0x35   : > { %461 = vmatpush1.bf16.msra.mxu0 %v1358_v45  ;;  %1231 = vmatpush3.bf16.msra.mxu1 %v1361_v46 }
  0x36   : > { %462 = vmatprep.subr.bf16.mxu0 %v1364_v47  ;;  %1232 = vmatprep.subr.bf16.mxu1 %v1484_v40 }
  0x39   : > { %463 = vmatpush1.bf16.msra.mxu0 %v1362_v48  ;;  %1233 = vmatpush3.bf16.msra.mxu1 %v1365_v49 }
  0x3a   : > { %464 = vmatprep.subr.bf16.mxu0 %v1368_v50  ;;  %1234 = vmatprep.subr.bf16.mxu1 %v1484_v40 }
  0x3d   : > { %465 = vmatpush1.bf16.msra.mxu0 %v1366_v51  ;;  %1235 = vmatpush3.bf16.msra.mxu1 %v1369_v52 }
  0x3e   : > { %466 = vmatprep.subr.bf16.mxu0 %v1372_v53  ;;  %1236 = vmatprep.subr.bf16.mxu1 %v1484_v40 }
  0x41   : > { %467 = vmatpush1.bf16.msra.mxu0 %v1370_v54  ;;  %1237 = vmatpush3.bf16.msra.mxu1 %v1373_v55  ;;  %v104_v55 = vlaneseq }
  0x42   : > { %468 = vmatprep.subr.bf16.mxu0 %v1376_v56  ;;  %1238 = vmatprep.subr.bf16.mxu1 %v1484_v40 }
  0x43   : > { %v105_v56 = vshrl.u32 %v104_v55, 7 }
  0x45   : > { %469 = vmatpush1.bf16.msra.mxu0 %v1374_v57  ;;  %1239 = vmatpush3.bf16.msra.mxu1 %v1377_v58  ;;  %v102_v57 = vld [vmem:[%s1904_s2] sm:$0x3f] }
  0x46   : > { %470 = vmatprep.subr.bf16.mxu0 %v1380_v59  ;;  %1240 = vmatprep.subr.bf16.mxu1 %v1484_v40  ;;  %v530_v58 = vld [vmem:[%s1906_s4] sm:$0x7]  ;;  %v110_v59 = vsub.s32 1, %v105_v56 }
  0x49   : > { %471 = vmatpush1.bf16.msra.mxu0 %v1378_v60  ;;  %1241 = vmatpush3.bf16.msra.mxu1 %v1381_v61  ;;  %v118_v60 = vsub.s32 3, %v105_v56 }
  0x4a   : > { %675 = vmatprep.subr.bf16.mxu0 %v1384_v62  ;;  %934 = vmatprep.subr.bf16.mxu1 %v1387_v63  ;;  %v122_v63 = vsub.s32 4, %v105_v56 }
  0x4c   : > { %489 = vmatmul.mubr.bf16.vlgmr.msra.gmra.mrb[4].mxu0 %v1649_v38  ;;  %1243 = vmatmul.mubr.bf16.vlgmr.msra.gmra.mrb[4].mxu1 %v1744_v4  ;;  %v1434_v38 = vld [vmem:[%s1907_s5 + $0x68] ss:$12 sps:$4 sm:$0xff]  }
  0x4d   : > { %676 = vmatpush1.bf16.msra.mxu0 %v1382_v0  ;;  %935 = vmatpush1.bf16.msra.mxu1 %v1385_v3  ;;  %v789_v0 = vld [vmem:[%s1908_s6] sm:$0x7]  ;;  %v111_v3 = vrot.slane %v102_v57, %v110_v59 }
  0x4e   : > { %677 = vmatprep.subr.bf16.mxu0 %v1390_v6  ;;  %936 = vmatprep.subr.bf16.mxu1 %v1393_v7  ;;  %v119_v6 = vrot.slane %v102_v57, %v118_v60 }
  0x4f   : > { %707 = vmatprep.mubr.bf16.mxu0 %v1483_v5  ;;  %966 = vmatprep.mubr.bf16.mxu1 %v1483_v5  ;;  %v1405_v5 = vld [vmem:[%s1907_s5 + $0x4c] ss:$12 sps:$4 sm:$0xff]  }
  0x51   : > { %678 = vmatpush1.bf16.msra.mxu0 %v1388_v8  ;;  %937 = vmatpush1.bf16.msra.mxu1 %v1391_v9  ;;  %v123_v9 = vrot.slane %v102_v57, %v122_v63 }
  0x52   : > { %679 = vmatprep.subr.bf16.mxu0 %v1396_v10  ;;  %938 = vmatprep.subr.bf16.mxu1 %v1399_v11  ;;  %v798_v10 = vrot.slane %v789_v0, %v110_v59 }
  0x55   : > { %680 = vmatpush1.bf16.msra.mxu0 %v1394_v12  ;;  %939 = vmatpush1.bf16.msra.mxu1 %v1397_v13 }
  0x56   : > { %681 = vmatprep.subr.bf16.mxu0 %v1402_v14  ;;  %940 = vmatprep.subr.bf16.mxu1 %v1405_v5 }
  0x59   : > { %682 = vmatpush1.bf16.msra.mxu0 %v1400_v15  ;;  %941 = vmatpush1.bf16.msra.mxu1 %v1403_v16 }
  0x5a   : > { %683 = vmatprep.subr.bf16.mxu0 %v1408_v17  ;;  %942 = vmatprep.subr.bf16.mxu1 %v1411_v18 }
  0x5d   : > { %684 = vmatpush1.bf16.msra.mxu0 %v1406_v19  ;;  %943 = vmatpush1.bf16.msra.mxu1 %v1409_v20 }
  0x5e   : > { %685 = vmatprep.subr.bf16.mxu0 %v1414_v21  ;;  %944 = vmatprep.subr.bf16.mxu1 %v1417_v22 }
  0x61   : > { %686 = vmatpush1.bf16.msra.mxu0 %v1412_v23  ;;  %945 = vmatpush1.bf16.msra.mxu1 %v1415_v24 }
  0x62   : > { %687 = vmatprep.subr.bf16.mxu0 %v1420_v25  ;;  %946 = vmatprep.subr.bf16.mxu1 %v1423_v26 }
  0x65   : > { %688 = vmatpush1.bf16.msra.mxu0 %v1418_v27  ;;  %947 = vmatpush1.bf16.msra.mxu1 %v1421_v28 }
  0x66   : > { %689 = vmatprep.subr.bf16.mxu0 %v1426_v29  ;;  %948 = vmatprep.subr.bf16.mxu1 %v1429_v30 }
  0x69   : > { %690 = vmatpush1.bf16.msra.mxu0 %v1424_v31  ;;  %949 = vmatpush1.bf16.msra.mxu1 %v1427_v32 }
  0x6a   : > { %1246 = vmatprep.subr.bf16.mxu0 %v1484_v40 }
  0x6c   : > { %708 = vmatmul.mubr.bf16.vlgmr.msra.gmra.mrb[0].mxu0 %v1744_v4  ;;  %967 = vmatmul.mubr.bf16.vlgmr.msra.gmra.mrb[8].mxu1 %v756_v33  ;;  %v539_v4 = vrot.slane %v530_v58, %v110_v59 }
  0x6d   : > { %1247 = vmatpush3.bf16.msra.mxu0 %v1430_v34  ;;  %1262 = vmatprep.mubr.msk.bf16.mxu0 %vm1485_vm0, %v1484_v40 }
  0x6e   : > { %1248 = vmatprep.subr.bf16.mxu0 %v1484_v40  ;;  %v1268_v13 = vadd.f32 %v539_v4, %v111_v3 }
  0x71   : > { %1249 = vmatpush3.bf16.msra.mxu0 %v1431_v35  ;;  %v114_v35 = vsub.s32 2, %v105_v56 }
  0x72   : > { %1250 = vmatprep.subr.bf16.mxu0 %v1484_v40 }
  0x75   : > { %1251 = vmatpush3.bf16.msra.mxu0 %v1432_v36 }
  0x76   : > { %1252 = vmatprep.subr.bf16.mxu0 %v1484_v40 }
  0x79   : > { %1253 = vmatpush3.bf16.msra.mxu0 %v1433_v37  ;;  %v543_v37 = vrot.slane %v530_v58, %v114_v35 }
  0x7a   : > { %1254 = vmatprep.subr.bf16.mxu0 %v1484_v40 }
  0x7d   : > { %1255 = vmatpush3.bf16.msra.mxu0 %v1434_v38  ;;  %v115_v38 = vrot.slane %v102_v57, %v114_v35 }
  0x7e   : > { %1256 = vmatprep.subr.bf16.mxu0 %v1484_v40 }
  0x81   : > { %1257 = vmatpush3.bf16.msra.mxu0 %v1435_v39 }
  0x82   : > { %1258 = vmatprep.subr.bf16.mxu0 %v1484_v40 }
  0x85   : > { %1259 = vmatpush3.bf16.msra.mxu0 %v1436_v41 }
  0x86   : > { %1260 = vmatprep.subr.bf16.mxu0 %v1484_v40  ;;  %v106_v40 = vsub.s32 0, %v105_v56 }
  0x88   : > { %v107_v61 = vrot.slane %v102_v57, %v106_v40  ;;  %v535_v62 = vrot.slane %v530_v58, %v106_v40  ;;  %v794_v8 = vrot.slane %v789_v0, %v106_v40 }
  0x89   : > { %1261 = vmatpush3.bf16.msra.mxu0 %v1437_v42  ;;  %v126_v42 = vsub.s32 5, %v105_v56 }
  0x8a   : > { %v1266_v7 = vadd.f32 %v535_v62, %v107_v61 }
  0x8c   : > { %1263 = vmatmul.mubr.bf16.vlgmr.msra.gmra.mrb[8].mxu0 %v756_v33 }
  0xff   : > { %v1871_v43 = vpop.f32.mrb[0].mxu1 }
 0x100   : > { %v451_v44 = vpop.f32.mrb[1].mxu1 }
 0x101   : > { %v453_v45 = vpop.f32.mrb[2].mxu1  ;;  %v452_v14 = vadd.f32 %v451_v44, %v119_v6 }
 0x102   : > { %v454_v46 = vpop.f32.mrb[3].mxu1 }
 0x103   : > { %v450_v46 = vadd.f32 %v1871_v43, %v115_v38 }
 0x11f   : > { %v490_v47 = vpop.f32.mrb[4].mxu0  ;;  %v1873_v48 = vpop.f32.mrb[4].mxu1 }
 0x120   : > { %v1875_v49 = vpop.f32.mrb[5].mxu0  ;;  %v1244_v50 = vpop.f32.mrb[5].mxu1  ;;  %v491_v18 = vadd.f32 %v490_v47, %v123_v9  ;;  %v751_v44 = vadd.f32 %v1873_v48, %v543_v37 }
 0x121   : > { %v494_v51 = vpop.f32.mrb[6].mxu0  ;;  %v753_v52 = vpop.f32.mrb[6].mxu1  ;;  %v802_v50 = vrot.slane %v789_v0, %v114_v35 }
 0x122   : > { %v495_v53 = vpop.f32.mrb[7].mxu0  ;;  %v1245_v54 = vpop.f32.mrb[7].mxu1  ;;  %v127_v51 = vrot.slane %v102_v57, %v126_v42 }
 0x124   : > { %v493_v56 = vadd.f32 %v1875_v49, %v127_v51 }
 0x13f   : > { %v709_v11 = vpop.f32.mrb[0].mxu0  ;;  %v968_v12 = vpop.f32.mrb[8].mxu1 }
 0x140   : > { %v1267_v5 = vadd.f32 %v1266_v7, %v709_v11  ;;  %v969_v15 = vadd.f32 %v968_v12, %v794_v8  ;;  %v711_v16 = vpop.f32.mrb[1].mxu0  ;;  %v970_v17 = vpop.f32.mrb[9].mxu1 }
 0x141   : > { %v971_v19 = vadd.f32 %v970_v17, %v798_v10  ;;  %v713_v20 = vpop.f32.mrb[2].mxu0  ;;  %v972_v21 = vpop.f32.mrb[10].mxu1  ;;  %v1269_v26 = vadd.f32 %v1268_v13, %v711_v16 }
 0x142   : > { %v1199_v22 = vmul.f32 -1.442695, %v1267_v5  ;;  %v1036_v23 = vadd.f32 %v969_v15, %v452_v14  ;;  %v714_v24 = vpop.f32.mrb[3].mxu0  ;;  %v973_v25 = vpop.f32.mrb[11].mxu1 }
 0x143   : > { %v1043_v27 = vadd.f32 %v971_v19, %v491_v18  ;;  %v1200_v29 = vmul.f32 -1.442695, %v1269_v26 }
 0x144   : > { %1438 = vpow2.f32 %v1199_v22  ;;  %v1201_v28 = vmul.f32 -1.442695, %v1036_v23 }
 0x145   : > { %v1202_v30 = vmul.f32 -1.442695, %v1043_v27 }
 0x146   : > { %1440 = vpow2.f32 %v1201_v28 }
 0x147   : > { %1442 = vpow2.f32 %v1200_v29 }
 0x148   : > { %1444 = vpow2.f32 %v1202_v30 }
 0x14e   : > { %v1439_v31 = vpop.eup %1438 }
 0x14f   : > { %v1019_v32 = vadd.f32 1.0, %v1439_v31 }
 0x150   : > { %v1441_v33 = vpop.eup %1440 }
 0x151   : > { %1446 = vrcp.f32 %v1019_v32  ;;  %v1040_v34 = vadd.f32 1.0, %v1441_v33  ;;  %v1443_v36 = vpop.eup %1442 }
 0x152   : > { %v1026_v39 = vadd.f32 1.0, %v1443_v36  ;;  %v1445_v41 = vpop.eup %1444 }
 0x153   : > { %1448 = vrcp.f32 %v1040_v34  ;;  %v1047_v53 = vadd.f32 1.0, %v1445_v41 }
 0x154   : > { %1450 = vrcp.f32 %v1026_v39 }
 0x15b   : > { %v1447_v45 = vpop.eup %1446 }
 0x15c   : > { %v1029_v47 = vmul.f32 %v1447_v45, %v751_v44 }
 0x15d   : > { %v1449_v58 = vpop.eup %1448 }
 0x15e   : > { %v1030_v52 = vadd.f32 %v1029_v47, %v450_v46  ;;  %v1451_v43 = vpop.eup %1450 }
 0x15f   : > { %v1009_v54 = vpop.f32.mrb[8].mxu0  ;;  %v1032_v62 = vsub.f32 1.0, %v1451_v43  ;;  %v1034_v0 = vmul.f32 %v1476_v1, %v1451_v43 }
 0x160   : > { %1452 = vtanh.f32 %v1030_v52  ;;  %v1010_v55 = vadd.f32 %v1009_v54, %v802_v50  ;;  %v1264_v40 = vpop.f32.mrb[9].mxu0 }
 0x161   : > { %v1012_v59 = vpop.f32.mrb[10].mxu0  ;;  %1454 = vrcp.f32 %v1047_v53 }
 0x162   : > { %v1050_v48 = vmul.f32 %v1449_v58, %v1010_v55  ;;  %v1265_v60 = vpop.f32.mrb[11].mxu0 }
 0x164   : > { %v1051_v61 = vadd.f32 %v1050_v48, %v493_v56 }
 0x166   : > { %1456 = vtanh.f32 %v1051_v61 }
 0x16a   : > { %v1453_v63 = vpop.eup %1452 }
 0x16b   : > { %v1033_v57 = vmul.f32 %v1453_v63, %v1032_v62  ;;  %v1455_v3 = vpop.eup %1454 }
 0x16c   : > { %v1053_v4 = vsub.f32 1.0, %v1455_v3  ;;  %v1055_v7 = vmul.f32 %v1472_v2, %v1455_v3 }
 0x16d   : > { %v1035_v1 = vadd.f32 %v1034_v0, %v1033_v57  }
 0x170   : > { %v1457_v6 = vpop.eup %1456 }
 0x171   : > { %v1054_v8 = vmul.f32 %v1457_v6, %v1053_v4  ;;  %48 = sbr.rel (!%p46_p0) target bundleno = 10 (0xa), region = 61 }
 0x173   : > { %v1056_v2 = vadd.f32 %v1055_v7, %v1054_v8  }
 0x175   : > { %v1059_v49 = vcombine.low %v1035_v1, %v1056_v2 }
 0x177   : > { %1205 = vst.sshfl [vmem:[%s1070_s8] sm:$0x33 pattern:$0x76325410] %v1059_v49 }
 0x178   :  { %1206 = vst.sshfl [vmem:[#allocation2] sm:$0x33 pattern:$0x76325410] %v1059_v49 }

// kernel: sst_ad_prerel_forward.5
= control target key start
LH: loop header
LB: loop body
LE: loop exit
PB: predicated region body
PF: predicated region fallthrough
CT: control target
= control target key end

     0   :  { %s2981_s0 = inlined_call_operand.vmem [shape: f32[2,8,256], index: 0, kind: input, shape index: {}]   ;;  %s2982_s1 = inlined_call_operand.vmem [shape: bf16[128,16], index: 1, kind: input, shape index: {}]   ;;  %s2983_s2 = inlined_call_operand.vmem [shape: f32[1,16], index: 2, kind: input, shape index: {}]   ;;  %s2984_s3 = inlined_call_operand.vmem [shape: bf16[128,21], index: 3, kind: input, shape index: {}]   ;;  %s2985_s4 = inlined_call_operand.vmem [shape: f32[1,21], index: 4, kind: input, shape index: {}]   ;;  %s2986_s5 = inlined_call_operand.vmem [shape: bf16[256,336], index: 5, kind: input, shape index: {}]   ;;  %s2987_s6 = inlined_call_operand.vmem [shape: f32[1,336], index: 6, kind: input, shape index: {}]   ;;  %s2988_s7 = inlined_call_operand.vmem [shape: f32[336,16], index: 7, kind: input, shape index: {}]   ;;  %s2989_s8 = inlined_call_operand.vmem [shape: f32[16,336], index: 8, kind: input, shape index: {}]   ;;  %s2990_s9 = inlined_call_operand.hbm [shape: f32[2,8,16], index: 9, kind: output, shape index: {0}]   ;;  %s2991_s10 = inlined_call_operand.hbm [shape: f32[2,8,21], index: 10, kind: output, shape index: {1}]   ;;  %s2992_s11 = inlined_call_operand.vmem [shape: f32[2,8,336], index: 11, kind: output, shape index: {2}]   ;;  %s2993_s12 = inlined_call_operand.vmem [shape: f32[2,8,336], index: 12, kind: output, shape index: {3}]  }
   0x1   :  { %2997 = sst [smem:[#allocation11_spill]] %s2981_s0 }
   0x2   :  { %2998 = sst [smem:[#allocation12_spill]] %s2982_s1 }
   0x3   :  { %2999 = sst [smem:[#allocation13_spill]] %s2983_s2 }
   0x4   :  { %3000 = sst [smem:[#allocation14_spill]] %s2984_s3 }
   0x5   :  { %3001 = sst [smem:[#allocation15_spill]] %s2985_s4 }
   0x6   :  { %18 = vsyncpa [#allocation3], 0 }
   0x7   :  { %20 = vsyncpa [#allocation3 + $0x1], 0 }
   0x8   :  { %21 = vsyncpa [#allocation5], 0 }
   0x9   :  { %23 = vsyncpa [#allocation5 + $0x1], 0  ;;  %s2407_s21 = smov 0   ;;  %s2409_s22 = smov 0  }
   0xa   :  { %s2411_s23 = smov 0   ;;  %s2413_s24 = smov 0  }
   0xb   :  { %s2415_s25 = smov 0   ;;  %s2417_s26 = smov 0  }
   0xc LB: > { %3002 = sst [smem:[#allocation8_spill]] %s2331_s25  ;;  %s1764_s27 = sadd.s32 4294967295, %s2335_s26   ;;  %s2335_s26 = sphi %s2417_s26, %s29_s26   ;;  %s2331_s25 = sphi %s2415_s25, %s3015_s25   ;;  %s2327_s24 = sphi %s2413_s24, %s3014_s24   ;;  %s2323_s23 = sphi %s2411_s23, %s3018_s23   ;;  %s2319_s22 = sphi %s2409_s22, %s3017_s22   ;;  %s2315_s21 = sphi %s2407_s21, %s3016_s21  }
   0xd   : > { %s1765_s28 = sadd.s32 4294967294, %s2335_s26   ;;  %s41_s29 = sadd.s32 1, %s2331_s25 }
   0xe   : > { %s246_s30 = sadd.s32 1, %s2323_s23  ;;  %p43_p0 = scmp.ge.s32.totalorder %s41_s29, 2 }
   0xf   : > { %p256_p1 = scmp.ne.s32.totalorder %s2323_s23, %s2319_s22  ;;  %p257_p2 = scmp.eq.s32.totalorder %s1764_s27, 1 }
  0x10   : > { %p262_p3 = scmp.ne.s32.totalorder %s2319_s22, %s2315_s21  ;;  %s3020_s29 = smov (%p43_p0, %s41_s29), 0 }
  0x11   : > { %3003 = sst [smem:[#allocation9_spill]] %s3020_s29  ;;  %p2447_p4 = por %p257_p2, %p256_p1 }
  0x12   : > { %p263_p5 = scmp.eq.s32.totalorder %s1765_s28, 1  ;;  %s241_s14 = ssub.s32 %s2331_s25, %s3020_s29 }
  0x13   : > { %p1768_p6 = scmp.ge.s32.totalorder %s2335_s26, 1  ;;  %p244_p7 = scmp.eq.s32.totalorder %s241_s14, 0 }
  0x14   : > { %p2454_p8 = por %p263_p5, %p262_p3  ;;  %p401_p9 = scmp.lt.s32.totalorder %s2335_s26, 3 }
  0x15   : > { %s2460_s16 = scalar_select %p244_p7, %s2323_s23, %s246_s30  }
  0x16   : > { %p402_p10 = pnand %p1768_p6, %p401_p9 }
  0x17   : > { %3006 = sst [smem:[#allocation10_spill]] %s2460_s16  ;;  %s3007_s1 = sld [smem:[#allocation12_spill]] (!%p402_p10)  ;;  %v2337_v1 = vmov (!%p402_p10), 0.0   ;;  %vm2338_vm0 = vmmov (!%p402_p10), 0   ;;  %v2140_v16 = vld [vmem:[%s2986_s5 + $0x4] ss:$12 sps:$4 sm:$0xff] (!%p402_p10)  }
  0x18   : > { %405 = sbr.rel (%p402_p10) target bundleno = 950 (0x3b6), region = 56  ;;  %1941 = vmatprep.subr.bf16.mxu0 (!%p402_p10), %v2337_v1  ;;  %1961 = vmatprep.subr.bf16.mxu1 (!%p402_p10), %v2337_v1  ;;  %s3008_s3 = sld [smem:[#allocation14_spill]] (!%p402_p10)  ;;  %v2138_v18 = vld [vmem:[%s2986_s5] ss:$12 sps:$4 sm:$0xff] (!%p402_p10)   ;;  %v2144_v19 = vld [vmem:[%s2986_s5 + $0x1c] ss:$12 sps:$4 sm:$0xff] (!%p402_p10)  }
  0x19   : > { %1957 = vmatprep.mubr.msk.bf16.mxu0 (!%p402_p10), %vm2338_vm0, %v2337_v1  ;;  %1977 = vmatprep.mubr.msk.bf16.mxu1 (!%p402_p10), %vm2338_vm0, %v2337_v1  ;;  %p470_p11 = scmp.lt.s32.totalorder (!%p402_p10), %s2327_s24, 1  ;;  %s3009_s0 = sld [smem:[#allocation11_spill]] (!%p402_p10)  ;;  %v2142_v22 = vld [vmem:[%s2986_s5 + $0x18] ss:$12 sps:$4 sm:$0xff] (!%p402_p10)   ;;  %v2148_v23 = vld [vmem:[%s2986_s5 + $0x34] ss:$12 sps:$4 sm:$0xff] (!%p402_p10)  }
  0x1a   : > { %v2169_v26 = vld [vmem:[%s2986_s5 + $0xc8] ss:$12 sps:$4 sm:$0xff] (!%p402_p10)   ;;  %v2146_v27 = vld [vmem:[%s2986_s5 + $0x30] ss:$12 sps:$4 sm:$0xff] (!%p402_p10)   ;;  %v2152_v28 = vld [vmem:[%s2986_s5 + $0x4c] ss:$12 sps:$4 sm:$0xff] (!%p402_p10)  }
  0x1b   : > { %v2170_v29 = vld [vmem:[%s2986_s5 + $0x8] ss:$12 sps:$4 sm:$0xff] (!%p402_p10)   ;;  %v2174_v30 = vld [vmem:[%s2986_s5 + $0xe0] ss:$12 sps:$4 sm:$0xff] (!%p402_p10)   ;;  %v2156_v33 = vld [vmem:[%s2986_s5 + $0x64] ss:$12 sps:$4 sm:$0xff] (!%p402_p10)  }
  0x1c   : > { %v2150_v31 = vld [vmem:[%s2986_s5 + $0x48] ss:$12 sps:$4 sm:$0xff] (!%p402_p10)   ;;  %v2175_v32 = vld [vmem:[%s2986_s5 + $0x20] ss:$12 sps:$4 sm:$0xff] (!%p402_p10)   ;;  %v2179_v34 = vld [vmem:[%s2986_s5 + $0xf8] ss:$12 sps:$4 sm:$0xff] (!%p402_p10)  }
  0x1d   : > { %v2129_v0 = vld [vmem:[%s3007_s1] sm:$0xff] (!%p402_p10)   ;;  %v2130_v2 = vld [vmem:[%s3007_s1 + $0x8] sm:$0xff] (!%p402_p10)   ;;  %v2131_v3 = vld [vmem:[%s3007_s1 + $0x10] sm:$0xff] (!%p402_p10)   ;;  %s3010_s2 = sld [smem:[#allocation13_spill]] (!%p402_p10)  ;;  %s3011_s4 = sld [smem:[#allocation15_spill]] (!%p402_p10)  ;;  %vm1506_vm1 = vcmask (!%p402_p10), 171008  }
  0x1e   : > { %1942 = vmatpush3.bf16.msra.mxu0 (!%p402_p10), %v2129_v0  ;;  %v2137_v4 = vld [vmem:[%s3008_s3] sm:$0xff] (!%p402_p10)   ;;  %v2132_v5 = vld [vmem:[%s3007_s1 + $0x18] sm:$0xff] (!%p402_p10)   ;;  %v2141_v6 = vld [vmem:[%s3008_s3 + $0x8] sm:$0xff] (!%p402_p10)   ;;  %vm1354_vm2 = vcmask (!%p402_p10), 130048   ;;  %vm1148_vm3 = vcmask (!%p402_p10), 654336   ;;  %s1847_s16 = sshll.u32 (!%p402_p10), %s2327_s24, 7 }
  0x1f   : > { %1943 = vmatprep.subr.bf16.mxu0 %v2337_v1  ;;  %1962 = vmatpush3.bf16.msra.mxu1 %v2137_v4  ;;  %v2133_v7 = vld [vmem:[%s3007_s1 + $0x20] sm:$0xff]   ;;  %v2145_v8 = vld [vmem:[%s3008_s3 + $0x10] sm:$0xff]   ;;  %s2500_s17 = scalar_select %p470_p11, %s2327_s24, 1  ;;  %v2134_v9 = vld [vmem:[%s3007_s1 + $0x28] sm:$0xff]  }
  0x20   : > { %1963 = vmatprep.subr.bf16.mxu1 %v2337_v1  ;;  %v2149_v10 = vld [vmem:[%s3008_s3 + $0x18] sm:$0xff]   ;;  %v2135_v11 = vld [vmem:[%s3007_s1 + $0x30] sm:$0xff]   ;;  %v2153_v12 = vld [vmem:[%s3008_s3 + $0x20] sm:$0xff]  }
  0x21   : > { %s1851_s28 = sshll.u32 %s2500_s17, 4  ;;  %v2136_v13 = vld [vmem:[%s3007_s1 + $0x38] sm:$0xff]   ;;  %v2157_v15 = vld [vmem:[%s3008_s3 + $0x28] sm:$0xff]   ;;  %v2161_v20 = vld [vmem:[%s3008_s3 + $0x30] sm:$0xff]   ;;  %s2996_s25 = smul.u32 24, %s2500_s17 }
  0x22   : > { %1944 = vmatpush3.bf16.msra.mxu0 %v2130_v2  ;;  %s478_s27 = scalar_lea.vmem %s3009_s0, %s1851_s28  ;;  %v2165_v24 = vld [vmem:[%s3008_s3 + $0x38] sm:$0xff]   ;;  %v2154_v35 = vld [vmem:[%s2986_s5 + $0x60] ss:$12 sps:$4 sm:$0xff]   ;;  %v2189_v42 = vld [vmem:[%s2986_s5 + $0x128] ss:$12 sps:$4 sm:$0xff]   ;;  %s2749_s28 = sand.u32 1, %s2319_s22  }
  0x23   : > { %1945 = vmatprep.subr.bf16.mxu0 %v2337_v1  ;;  %1964 = vmatpush3.bf16.msra.mxu1 %v2141_v6  ;;  %v498_v14 = vld [vmem:[%s478_s27] sm:$0xff]  ;;  %v499_v21 = vld [vmem:[%s478_s27 + $0x8] sm:$0xff]  ;;  %v2184_v38 = vld [vmem:[%s2986_s5 + $0x110] ss:$12 sps:$4 sm:$0xff]   ;;  %s1769_s30 = sshll.u32 %s2749_s28, 3  ;;  %s487_s20 = scalar_lea.vmem %s2992_s11, %s2996_s25 }
  0x24   : > { %1965 = vmatprep.subr.bf16.mxu1 %v2337_v1  ;;  %v2533_v17 = vpack.c.bf16 %v498_v14, %v498_v14  ;;  %v501_v25 = vpack.c.bf16 %v499_v21, %v499_v21  ;;  %v2160_v36 = vld [vmem:[%s2986_s5 + $0x7c] ss:$12 sps:$4 sm:$0xff]   ;;  %v2180_v37 = vld [vmem:[%s2986_s5 + $0x38] ss:$12 sps:$4 sm:$0xff]   ;;  %v2164_v40 = vld [vmem:[%s2986_s5 + $0x94] ss:$12 sps:$4 sm:$0xff]   ;;  %s2904_s27 = scalar_lea.hbm %s2990_s9, %s1847_s16 }
  0x25   : > { %v2158_v39 = vld [vmem:[%s2986_s5 + $0x78] ss:$12 sps:$4 sm:$0xff]   ;;  %v2185_v41 = vld [vmem:[%s2986_s5 + $0x50] ss:$12 sps:$4 sm:$0xff]   ;;  %v2190_v44 = vld [vmem:[%s2986_s5 + $0x68] ss:$12 sps:$4 sm:$0xff]  }
  0x26   : > { %1946 = vmatpush3.bf16.msra.mxu0 %v2131_v3  ;;  %v2162_v43 = vld [vmem:[%s2986_s5 + $0x90] ss:$12 sps:$4 sm:$0xff]   ;;  %v2168_v45 = vld [vmem:[%s2986_s5 + $0xac] ss:$12 sps:$4 sm:$0xff]   ;;  %v2166_v47 = vld [vmem:[%s2986_s5 + $0xa8] ss:$12 sps:$4 sm:$0xff]  }
  0x27   : > { %1947 = vmatprep.subr.bf16.mxu0 %v2337_v1  ;;  %1966 = vmatpush3.bf16.msra.mxu1 %v2145_v8  ;;  %v2194_v46 = vld [vmem:[%s2986_s5 + $0x140] ss:$12 sps:$4 sm:$0xff]   ;;  %v2173_v49 = vld [vmem:[%s2986_s5 + $0xc4] ss:$12 sps:$4 sm:$0xff]   ;;  %v2178_v53 = vld [vmem:[%s2986_s5 + $0xdc] ss:$12 sps:$4 sm:$0xff]  }
  0x28   : > { %1967 = vmatprep.subr.bf16.mxu1 %v2337_v1  ;;  %v2195_v48 = vld [vmem:[%s2986_s5 + $0x80] ss:$12 sps:$4 sm:$0xff]   ;;  %v2199_v50 = vld [vmem:[%s2986_s5 + $0x158] ss:$12 sps:$4 sm:$0xff]   ;;  %v2204_v54 = vld [vmem:[%s2986_s5 + $0x170] ss:$12 sps:$4 sm:$0xff]  }
  0x29   : > { %v2171_v51 = vld [vmem:[%s2986_s5 + $0xc0] ss:$12 sps:$4 sm:$0xff]   ;;  %v2200_v52 = vld [vmem:[%s2986_s5 + $0x98] ss:$12 sps:$4 sm:$0xff]   ;;  %v2205_v56 = vld [vmem:[%s2986_s5 + $0xb0] ss:$12 sps:$4 sm:$0xff]  }
  0x2a   : > { %1948 = vmatpush3.bf16.msra.mxu0 %v2132_v5  ;;  %v2176_v55 = vld [vmem:[%s2986_s5 + $0xd8] ss:$12 sps:$4 sm:$0xff]   ;;  %v2183_v57 = vld [vmem:[%s2986_s5 + $0xf4] ss:$12 sps:$4 sm:$0xff]   ;;  %v2181_v58 = vld [vmem:[%s2986_s5 + $0xf0] ss:$12 sps:$4 sm:$0xff]  }
  0x2b   : > { %1949 = vmatprep.subr.bf16.mxu0 %v2337_v1  ;;  %1968 = vmatpush3.bf16.msra.mxu1 %v2149_v10  ;;  %v2188_v59 = vld [vmem:[%s2986_s5 + $0x10c] ss:$12 sps:$4 sm:$0xff]   ;;  %v2186_v60 = vld [vmem:[%s2986_s5 + $0x108] ss:$12 sps:$4 sm:$0xff]   ;;  %v2193_v61 = vld [vmem:[%s2986_s5 + $0x124] ss:$12 sps:$4 sm:$0xff]  }
  0x2c   : > { %1969 = vmatprep.subr.bf16.mxu1 %v2337_v1  ;;  %v2191_v62 = vld [vmem:[%s2986_s5 + $0x120] ss:$12 sps:$4 sm:$0xff]   ;;  %v2198_v63 = vld [vmem:[%s2986_s5 + $0x13c] ss:$12 sps:$4 sm:$0xff]   ;;  %v2196_v0 = vld [vmem:[%s2986_s5 + $0x138] ss:$12 sps:$4 sm:$0xff]  }
  0x2d   : > { %v2203_v2 = vld [vmem:[%s2986_s5 + $0x154] ss:$12 sps:$4 sm:$0xff]   ;;  %v2201_v3 = vld [vmem:[%s2986_s5 + $0x150] ss:$12 sps:$4 sm:$0xff]   ;;  %v2208_v4 = vld [vmem:[%s2986_s5 + $0x16c] ss:$12 sps:$4 sm:$0xff]  }
  0x2e   : > { %1950 = vmatpush3.bf16.msra.mxu0 %v2133_v7  ;;  %v2206_v5 = vld [vmem:[%s2986_s5 + $0x168] ss:$12 sps:$4 sm:$0xff]   ;;  %v1179_v6 = vld [vmem:[%s2988_s7 + $0x80] sm:$0xff]  ;;  %s2755_s14 = scalar_lea.vmem [#allocation4], %s1769_s30  ;;  %s2758_s18 = scalar_lea.vmem [#allocation2], %s1769_s30 }
  0x2f   : > { %1951 = vmatprep.subr.bf16.mxu0 %v2337_v1  ;;  %1970 = vmatpush3.bf16.msra.mxu1 %v2153_v12  ;;  %v1180_v7 = vld [vmem:[%s2988_s7 + $0x88] sm:$0xff]  ;;  %v1163_v8 = vld [vmem:[%s2988_s7] sm:$0xff]  ;;  %v1182_v12 = vld [vmem:[%s2988_s7 + $0x98] sm:$0xff]  ;;  %s1552_s1 = sshll.u32 %s2758_s18, 4  ;;  %s2340_s30 = smov [#allocation2]   ;;  %s1553_s1 = int_to_ptr.vmem [resolvable:$true] %s1552_s1 }
  0x30   : > { %1971 = vmatprep.subr.bf16.mxu1 %v2337_v1  ;;  %v1164_v10 = vld [vmem:[%s2988_s7 + $0x8] sm:$0xff]  ;;  %v1195_v21 = vld [vmem:[%s2988_s7 + $0x100] sm:$0xff]  ;;  %s2225_s0 = scalar_lea.vmem %s1553_s1, 128  ;;  %s2229_s19 = sshll.u32 %s2340_s30, 4  ;;  %s2230_s19 = int_to_ptr.vmem [resolvable:$false] %s2229_s19 }
  0x31   : > { %v2013_v14 = vpack.c.bf16 %v1164_v10, %v1163_v8  ;;  %p2226_p12 = scmp.ne.s32.totalorder %s1553_s1, %s2225_s0  ;;  %s2231_s29 = scalar_lea.vmem %s2230_s19, 256 }
  0x32   : > { %1952 = vmatpush3.bf16.msra.mxu0 %v2134_v9  ;;  %v2011_v9 = vpack.c.bf16 %v1180_v7, %v1179_v6  ;;  %p2232_p1 = scmp.lt.s32.totalorder %s1553_s1, %s2230_s19  ;;  %p2233_p2 = scmp.lt.s32.totalorder %s2231_s29, %s2225_s0 }
  0x33   : > { %1953 = vmatprep.subr.bf16.mxu0 %v2337_v1  ;;  %1972 = vmatpush3.bf16.msra.mxu1 %v2157_v15  ;;  %p2227_p13 = pnand %p2226_p12, %p2447_p4 }
  0x34   : > { %1973 = vmatprep.subr.bf16.mxu1 %v2337_v1  ;;  %p2234_p3 = por %p2233_p2, %p2232_p1 }
  0x35   : > { %p2228_p0 = pneg %p2227_p13 }
  0x36   : > { %1954 = vmatpush3.bf16.msra.mxu0 %v2135_v11  ;;  %v1181_v11 = vld [vmem:[%s2988_s7 + $0x90] sm:$0xff] }
  0x37   : > { %1955 = vmatprep.subr.bf16.mxu0 %v2337_v1  ;;  %1974 = vmatpush3.bf16.msra.mxu1 %v2161_v20  ;;  %v2015_v15 = vpack.c.bf16 %v1182_v12, %v1181_v11  ;;  %v1187_v11 = vld [vmem:[%s2988_s7 + $0xc0] sm:$0xff]  ;;  %v1188_v12 = vld [vmem:[%s2988_s7 + $0xc8] sm:$0xff]  ;;  %p2235_p5 = pnand %p2234_p3, %p2228_p0 }
  0x38   : > { %1975 = vmatprep.subr.bf16.mxu1 %v2337_v1 }
  0x3a   : > { %1956 = vmatpush3.bf16.msra.mxu0 %v2136_v13  ;;  %v2339_v13 = vmov 0.0|0.0  }
  0x3b   : > { %1067 = vmatprep.subr.bf16.mxu0 %v2140_v16  ;;  %1976 = vmatpush3.bf16.msra.mxu1 %v2165_v24  ;;  %v1165_v16 = vld [vmem:[%s2988_s7 + $0x10] sm:$0xff]  ;;  %v1168_v24 = vld [vmem:[%s2988_s7 + $0x28] sm:$0xff] }
  0x3c   : > { %1870 = vmatprep.subr.bf16.mxu1 %v2169_v26  ;;  %v1185_v26 = vld [vmem:[%s2988_s7 + $0xb0] sm:$0xff] }
  0x3d   : > { %1958 = vmatmul.mubr.bf16.vlgmr.msra.gmra.mrb[0].mxu0 %v2533_v17 }
  0x3e   : > { %1068 = vmatpush1.bf16.msra.mxu0 %v2138_v18  ;;  %1099 = vmatprep.mubr.bf16.mxu0 %v501_v25  ;;  %v1183_v18 = vld [vmem:[%s2988_s7 + $0xa0] sm:$0xff] }
  0x3f   : > { %1069 = vmatprep.subr.bf16.mxu0 %v2144_v19  ;;  %1978 = vmatmul.mubr.bf16.vlgmr.msra.gmra.mrb[0].mxu1 %v501_v25  ;;  %v1184_v19 = vld [vmem:[%s2988_s7 + $0xa8] sm:$0xff] }
  0x40   : > { %1871 = vmatpush3.bf16.msra.mxu1 %v2170_v29  ;;  %1140 = vmatprep.mubr.bf16.mxu1 %v501_v25  ;;  %v1196_v25 = vld [vmem:[%s2988_s7 + $0x108] sm:$0xff] }
  0x41   : > { %1872 = vmatprep.subr.bf16.mxu1 %v2174_v30 }
  0x42   : > { %1070 = vmatpush1.bf16.msra.mxu0 %v2142_v22  ;;  %v2019_v22 = vpack.c.bf16 %v1184_v19, %v1183_v18  ;;  %v1172_v18 = vld [vmem:[%s2988_s7 + $0x48] sm:$0xff] }
  0x43   : > { %1071 = vmatprep.subr.bf16.mxu0 %v2148_v23  ;;  %v1167_v23 = vld [vmem:[%s2988_s7 + $0x20] sm:$0xff] }
  0x44   : > { %1873 = vmatpush3.bf16.msra.mxu1 %v2175_v32  ;;  %v2021_v29 = vpack.c.bf16 %v1168_v24, %v1167_v23  ;;  %v1170_v32 = vld [vmem:[%s2988_s7 + $0x38] sm:$0xff]  ;;  %v1199_v23 = vld [vmem:[%s2988_s7 + $0x120] sm:$0xff] }
  0x45   : > { %1874 = vmatprep.subr.bf16.mxu1 %v2179_v34  ;;  %v1775_v34 = vld [vmem:[%s3010_s2] ss:$0 sm:$0xff] }
  0x46   : > { %1072 = vmatpush1.bf16.msra.mxu0 %v2146_v27  ;;  %v1186_v27 = vld [vmem:[%s2988_s7 + $0xb8] sm:$0xff] }
  0x47   : > { %1073 = vmatprep.subr.bf16.mxu0 %v2152_v28  ;;  %v2044_v28 = vpack.c.bf16 %v1196_v25, %v1195_v21  ;;  %v2023_v30 = vpack.c.bf16 %v1186_v27, %v1185_v26  ;;  %v1189_v21 = vld [vmem:[%s2988_s7 + $0xd0] sm:$0xff]  ;;  %v1200_v25 = vld [vmem:[%s2988_s7 + $0x128] sm:$0xff]  ;;  %v1174_v27 = vld [vmem:[%s2988_s7 + $0x58] sm:$0xff] }
  0x48   : > { %1875 = vmatpush3.bf16.msra.mxu1 %v2180_v37  ;;  %v1173_v26 = vld [vmem:[%s2988_s7 + $0x50] sm:$0xff] }
  0x49   : > { %1876 = vmatprep.subr.bf16.mxu1 %v2184_v38 }
  0x4a   : > { %1074 = vmatpush1.bf16.msra.mxu0 %v2150_v31  ;;  %v1169_v31 = vld [vmem:[%s2988_s7 + $0x30] sm:$0xff] }
  0x4b   : > { %1075 = vmatprep.subr.bf16.mxu0 %v2156_v33  ;;  %v2025_v33 = vpack.c.bf16 %v1170_v32, %v1169_v31  ;;  %v1192_v31 = vld [vmem:[%s2988_s7 + $0xe8] sm:$0xff]  ;;  %v1201_v32 = vld [vmem:[%s2988_s7 + $0x130] sm:$0xff] }
  0x4c   : > { %1877 = vmatpush3.bf16.msra.mxu1 %v2185_v41  ;;  %v1785_v41 = vld [vmem:[%s3011_s4] ss:$0 sm:$0xff] }
  0x4d   : > { %1878 = vmatprep.subr.bf16.mxu1 %v2189_v42 }
  0x4e   : > { %1076 = vmatpush1.bf16.msra.mxu0 %v2154_v35 }
  0x4f   : > { %1077 = vmatprep.subr.bf16.mxu0 %v2160_v36 }
  0x50   : > { %1879 = vmatpush3.bf16.msra.mxu1 %v2190_v44 }
  0x51   : > { %1880 = vmatprep.subr.bf16.mxu1 %v2194_v46 }
  0x52   : > { %1078 = vmatpush1.bf16.msra.mxu0 %v2158_v39 }
  0x53   : > { %1079 = vmatprep.subr.bf16.mxu0 %v2164_v40 }
  0x54   : > { %1881 = vmatpush3.bf16.msra.mxu1 %v2195_v48 }
  0x55   : > { %1882 = vmatprep.subr.bf16.mxu1 %v2199_v50  ;;  %v796_v50 = vlaneseq }
  0x56   : > { %1080 = vmatpush1.bf16.msra.mxu0 %v2162_v43 }
  0x57   : > { %1081 = vmatprep.subr.bf16.mxu0 %v2168_v45 }
  0x58   : > { %1883 = vmatpush3.bf16.msra.mxu1 %v2200_v52 }
  0x59   : > { %1884 = vmatprep.subr.bf16.mxu1 %v2204_v54 }
  0x5a   : > { %1082 = vmatpush1.bf16.msra.mxu0 %v2166_v47 }
  0x5b   : > { %1083 = vmatprep.subr.bf16.mxu0 %v2173_v49 }
  0x5c   : > { %1885 = vmatpush3.bf16.msra.mxu1 %v2205_v56 }
  0x5d   : > { %2012 = vmatprep.subr.bf16.mxu1 %v2011_v9 }
  0x5e   : > { %1084 = vmatpush1.bf16.msra.mxu0 %v2171_v51  ;;  %v797_v51 = vshrl.u32 %v796_v50, 7 }
  0x5f   : > { %1085 = vmatprep.subr.bf16.mxu0 %v2178_v53  ;;  %1141 = vmatmul.mubr.bf16.vlgmr.msra.gmra.mrb[4].mxu1 %v2533_v17  ;;  %v794_v53 = vld [vmem:[%s2987_s6] sm:$0x7] }
  0x60   : > { %2014 = vmatpush3.bf16.msra.mxu1 %v2013_v14  ;;  %v806_v52 = vsub.s32 2, %v797_v51  ;;  %v1197_v14 = vld [vmem:[%s2988_s7 + $0x110] sm:$0xff] }
  0x61   : > { %2016 = vmatprep.subr.bf16.mxu1 %v2015_v15  ;;  %v2027_v15 = vpack.c.bf16 %v1188_v12, %v1187_v11 }
  0x62   : > { %1086 = vmatpush1.bf16.msra.mxu0 %v2176_v55  ;;  %v807_v55 = vrot.slane %v794_v53, %v806_v52 }
  0x63   : > { %1087 = vmatprep.subr.bf16.mxu0 %v2183_v57 }
  0x66   : > { %1088 = vmatpush1.bf16.msra.mxu0 %v2181_v58 }
  0x67   : > { %1089 = vmatprep.subr.bf16.mxu0 %v2188_v59 }
  0x6a   : > { %1090 = vmatpush1.bf16.msra.mxu0 %v2186_v60 }
  0x6b   : > { %1091 = vmatprep.subr.bf16.mxu0 %v2193_v61  ;;  %v798_v61 = vsub.s32 0, %v797_v51 }
  0x6e   : > { %1092 = vmatpush1.bf16.msra.mxu0 %v2191_v62  ;;  %v802_v62 = vsub.s32 1, %v797_v51 }
  0x6f   : > { %1093 = vmatprep.subr.bf16.mxu0 %v2198_v63  ;;  %v799_v63 = vrot.slane %v794_v53, %v798_v61  ;;  %v1348_v61 = vld [vmem:[%s2989_s8] sm:$0xff] }
  0x72   : > { %1094 = vmatpush1.bf16.msra.mxu0 %v2196_v0  ;;  %v803_v0 = vrot.slane %v794_v53, %v802_v62  ;;  %v1351_v62 = vld [vmem:[%s2989_s8 + $0x18] sm:$0xff] }
  0x73   : > { %1095 = vmatprep.subr.bf16.mxu0 %v2203_v2 }
  0x76   : > { %1096 = vmatpush1.bf16.msra.mxu0 %v2201_v3 }
  0x77   : > { %1097 = vmatprep.subr.bf16.mxu0 %v2208_v4 }
  0x7a   : > { %1098 = vmatpush1.bf16.msra.mxu0 %v2206_v5 }
  0x7b   : > { %2043 = vmatprep.subr.bf16.mxu0 %v2339_v13 }
  0x7d   : > { %1100 = vmatmul.mubr.bf16.vlgmr.msra.gmra.mrb[4].mxu0 %v2533_v17  ;;  %v1166_v17 = vld [vmem:[%s2988_s7 + $0x18] sm:$0xff] }
  0x7e   : > { %2001 = vmatprep.mubr.msk.f32.mxu0 %vm2338_vm0, %v2337_v1  ;;  %v2017_v20 = vpack.c.bf16 %v1166_v17, %v1165_v16  ;;  %2045 = vmatpush3.bf16.msra.mxu0 %v2044_v28  ;;  %v1198_v16 = vld [vmem:[%s2988_s7 + $0x118] sm:$0xff]  ;;  %v1171_v17 = vld [vmem:[%s2988_s7 + $0x40] sm:$0xff]  ;;  %v2050_v28 = vpack.c.bf16 %v1200_v25, %v1199_v23 }
  0x7f   : > { %2046 = vmatprep.subr.bf16.mxu0 %v2339_v13  ;;  %v2047_v19 = vpack.c.bf16 %v1198_v16, %v1197_v14 }
  0x80   : > { %2018 = vmatpush3.bf16.msra.mxu1 %v2017_v20  ;;  %v2029_v20 = vpack.c.bf16 %v1172_v18, %v1171_v17 }
  0x81   : > { %2020 = vmatprep.subr.bf16.mxu1 %v2019_v22  ;;  %v1190_v22 = vld [vmem:[%s2988_s7 + $0xd8] sm:$0xff] }
  0x82   : > { %2048 = vmatpush3.bf16.msra.mxu0 %v2047_v19  ;;  %v2031_v24 = vpack.c.bf16 %v1190_v22, %v1189_v21 }
  0x83   : > { %2049 = vmatprep.subr.bf16.mxu0 %v2339_v13 }
  0x84   : > { %2022 = vmatpush3.bf16.msra.mxu1 %v2021_v29  ;;  %v2033_v29 = vpack.c.bf16 %v1174_v27, %v1173_v26 }
  0x85   : > { %2024 = vmatprep.subr.bf16.mxu1 %v2023_v30  ;;  %v1191_v30 = vld [vmem:[%s2988_s7 + $0xe0] sm:$0xff] }
  0x86   : > { %2051 = vmatpush3.bf16.msra.mxu0 %v2050_v28 }
  0x87   : > { %2052 = vmatprep.subr.bf16.mxu0 %v2339_v13 }
  0x88   : > { %2026 = vmatpush3.bf16.msra.mxu1 %v2025_v33  ;;  %v2035_v33 = vpack.c.bf16 %v1192_v31, %v1191_v30 }
  0x89   : > { %2028 = vmatprep.subr.bf16.mxu1 %v2027_v15 }
  0x8c   : > { %2030 = vmatpush3.bf16.msra.mxu1 %v2029_v20 }
  0x8d   : > { %2032 = vmatprep.subr.bf16.mxu1 %v2031_v24 }
  0x90   : > { %2034 = vmatpush3.bf16.msra.mxu1 %v2033_v29 }
  0x91   : > { %2036 = vmatprep.subr.bf16.mxu1 %v2035_v33 }
 0x110   : > { %v607_v35 = vpop.f32.mrb[0].mxu0 }
 0x111   : > { %v608_v36 = vadd.f32 %v1775_v34, %v607_v35  ;;  %v1959_v37 = vpop.f32.mrb[1].mxu0  ;;  %v1202_v34 = vld [vmem:[%s2988_s7 + $0x138] sm:$0xff]  ;;  %v1175_v35 = vld [vmem:[%s2988_s7 + $0x60] sm:$0xff] }
 0x112   : > { %v610_v38 = vpop.f32.mrb[2].mxu0  ;;  %v724_v42 = vpop.f32.mrb[0].mxu1  ;;  %v2053_v37 = vpack.c.bf16 %v1202_v34, %v1201_v32 }
 0x113   : > { %v1784_v39 = vmul.f32 -1.442695, %v608_v36  ;;  %v1960_v40 = vpop.f32.mrb[3].mxu0  ;;  %v725_v43 = vadd.f32 %v1785_v41, %v724_v42  ;;  %v1979_v44 = vpop.f32.mrb[1].mxu1  ;;  %v1176_v36 = vld [vmem:[%s2988_s7 + $0x68] sm:$0xff]  ;;  %v1203_v41 = vld [vmem:[%s2988_s7 + $0x140] sm:$0xff] }
 0x114   : > { %v727_v45 = vpop.f32.mrb[2].mxu1  ;;  %v2037_v38 = vpack.c.bf16 %v1176_v36, %v1175_v35  ;;  %v1194_v40 = vld [vmem:[%s2988_s7 + $0xf8] sm:$0xff]  ;;  %v1177_v44 = vld [vmem:[%s2988_s7 + $0x70] sm:$0xff]  ;;  %2054 = vmatpush3.bf16.msra.mxu0 %v2053_v37 }
 0x115   : > { %2209 = vpow2.f32 %v1784_v39  ;;  %v1980_v46 = vpop.f32.mrb[3].mxu1  ;;  %1507 = vst.msk [vmem:[%s2755_s14] sm:$0xff] %vm1506_vm1, %v725_v43  ;;  %v1193_v39 = vld [vmem:[%s2988_s7 + $0xf0] sm:$0xff]  ;;  %v1204_v43 = vld [vmem:[%s2988_s7 + $0x148] sm:$0xff]  ;;  %v1178_v45 = vld [vmem:[%s2988_s7 + $0x78] sm:$0xff]  ;;  %2055 = vmatprep.subr.bf16.mxu0 %v2339_v13 }
 0x116   : > { %v2039_v42 = vpack.c.bf16 %v1194_v40, %v1193_v39  ;;  %2038 = vmatpush3.bf16.msra.mxu1 %v2037_v38  ;;  %v2056_v46 = vpack.c.bf16 %v1204_v43, %v1203_v41 }
 0x118   : > { %2040 = vmatprep.subr.bf16.mxu1 %v2039_v42  ;;  %2057 = vmatpush3.bf16.msra.mxu0 %v2056_v46 }
 0x11f   : > { %v2210_v47 = vpop.eup %2209 }
 0x120   : > { %v616_v48 = vadd.f32 1.0, %v2210_v47  ;;  %v2041_v47 = vpack.c.bf16 %v1178_v45, %v1177_v44 }
 0x122   : > { %2211 = vrcp.f32 %v616_v48  ;;  %2042 = vmatpush3.bf16.msra.mxu1 %v2041_v47 }
 0x12c   : > { %v2212_v49 = vpop.eup %2211 }
 0x12d   : > { %1505 = vst.msk [vmem:[%s2758_s18] sm:$0xff] %vm1354_vm2, %v2212_v49 }
 0x132   : > { %v1886_v54 = vpop.f32.mrb[4].mxu1 }
 0x133   : > { %v1887_v56 = vpop.f32.mrb[5].mxu1 }
 0x134   : > { %v1888_v57 = vadd.f32 %v1887_v56, %v1886_v54  ;;  %v1889_v58 = vpop.f32.mrb[6].mxu1 }
 0x135   : > { %v1890_v59 = vpop.f32.mrb[7].mxu1  ;;  %v1349_v58 = vld [vmem:[%s2989_s8 + $0x8] sm:$0xff] }
 0x136   : > { %v2771_v60 = vadd.f32 %v1888_v57, %v807_v55  ;;  %v1352_v59 = vld [vmem:[%s2989_s8 + $0x20] sm:$0xff] }
 0x138   : > { %1510 = vst.msk [vmem:[%s487_s20 + $0x10] sm:$0xff] %vm1148_vm3, %v2771_v60  ;;  %v1149_v8 = vsel %vm1148_vm3, %v2771_v60, -inf }
 0x150   : > { %v1101_v2 = vpop.f32.mrb[4].mxu0 }
 0x151   : > { %v2775_v3 = vadd.f32 %v1101_v2, %v799_v63  ;;  %v1103_v4 = vpop.f32.mrb[5].mxu0  ;;  %v2060_v63 = vpack.c.bf16 %v1351_v62, %v1348_v61 }
 0x152   : > { %v2777_v5 = vadd.f32 %v1103_v4, %v803_v0  ;;  %v1105_v6 = vpop.f32.mrb[6].mxu0  ;;  %v1353_v4 = vld [vmem:[%s2989_s8 + $0x28] sm:$0xff] }
 0x153   : > { %1508 = vst [vmem:[%s487_s20] sm:$0xff] %v2775_v3  ;;  %v1106_v7 = vpop.f32.mrb[7].mxu0 }
 0x154   : > { %1509 = vst [vmem:[%s487_s20 + $0x8] sm:$0xff] %v2777_v5  ;;  %v1150_v9 = vmax.f32 %v2775_v3, %v2777_v5  ;;  %s1515_s20 = scalar_lea.sflag [#allocation3], %s2749_s28 }
 0x156   : > { %v1151_v10 = vmax.f32 %v1150_v9, %v1149_v8 }
 0x158   : > { %1152 = vmax.xlane.f32.xlu0 %v1151_v10 }
 0x1e5   : > { %v1153_v48 = vpop.xlane.xlu0 %1152 }
 0x1e6   : > { %v1154_v49 = vsub.f32 %v2775_v3, %v1153_v48  ;;  %v1155_v50 = vsub.f32 %v2777_v5, %v1153_v48  ;;  %v1156_v51 = vsub.f32 %v2771_v60, %v1153_v48  ;;  %v2058_v60 = vpack.c.bf16 %v1352_v59, %v1349_v58  ;;  %v1350_v3 = vld [vmem:[%s2989_s8 + $0x10] sm:$0xff] }
 0x1e7   : > { %v2063_v8 = vpack.c.bf16 %v1353_v4, %v1350_v3 }
 0x1e8   : > { %v1157_v52 = vmul.f32 1.442695, %v1154_v49  ;;  %v1159_v53 = vmul.f32 1.442695, %v1155_v50  ;;  %v1161_v54 = vmul.f32 1.442695, %v1156_v51  ;;  %2059 = vmatprep.subr.bf16.mxu1 %v2058_v60 }
 0x1ea   : > { %2213 = vpow2.f32 %v1157_v52 }
 0x1eb   : > { %2215 = vpow2.f32 %v1159_v53 }
 0x1ec   : > { %2217 = vpow2.f32 %v1161_v54 }
 0x1f4   : > { %v2863_v55 = vpop.eup %2213 }
 0x1f5   : > { %v2865_v56 = vpop.eup %2215 }
 0x1f6   : > { %v2867_v57 = vpop.eup %2217  ;;  %1272 = vmatprep.mubr.f32.mxu1 %v2865_v56 }
 0x1f7   : > { %2002 = vmatmul.mubr.msk.f32.vlgmr.msra.gmra.mrb[8].mxu0 %vm1148_vm3, %v2867_v57  ;;  %1273 = vmatmul.mubr.f32.vlgmr.msra.gmra.mrb[8].mxu1 %v2863_v55 }
 0x1f8   : > { %1422 = vmatprep.mubr.f32.mxu1 %v2337_v1  ;;  %2061 = vmatpush1.bf16.msra.mxu1 %v2060_v63 }
 0x1f9   : > { %2062 = vmatprep.subr.bf16.mxu1 %v2339_v13 }
 0x2ca   : > { %v1344_v0 = vpop.f32.mrb[8].mxu0  ;;  %v1924_v2 = vpop.f32.mrb[8].mxu1 }
 0x2cb   : > { %v2003_v5 = vpop.f32.mrb[9].mxu0  ;;  %v1925_v6 = vpop.f32.mrb[9].mxu1 }
 0x2cc   : > { %v1926_v7 = vadd.f32 %v1925_v6, %v1924_v2 }
 0x2ce   : > { %v1345_v9 = vadd.f32 %v1926_v7, %v1344_v0 }
 0x2d0   : > { %1843 = vmatmul.mubr.msk.f32.vlgmr.msra.gmra.mrb[10].mxu1 %vm1354_vm2, %v1345_v9 }
 0x2d1   : > { %2064 = vmatpush3.bf16.msra.mxu1 %v2063_v8  ;;  %2008 = vmatprep.mubr.msk.f32.mxu1 %vm2338_vm0, %v2337_v1 }
 0x2d4   : > { %2009 = vmatmul.mubr.msk.f32.vlgmr.msra.gmra.mrb[12].mxu1 %vm1354_vm2, %v1345_v9 }
 0x2d5   : > { %2238 = shalt.err (!%p2235_p5)
}
 0x2d6   : > { %s2239_s18 = scalar_lea.hbm %s2904_s27, 128  ;;  %s2243_s3 = scalar_lea.hbm %s2990_s9, 256 }
 0x2d7   : > { %p2240_p6 = scmp.ne.s32.totalorder %s2904_s27, %s2239_s18  ;;  %p2244_p10 = scmp.lt.u32.totalorder %s2904_s27, %s2990_s9 }
 0x2d8   : > { %p2245_p11 = scmp.lt.u32.totalorder %s2243_s3, %s2239_s18  ;;  %p2247_p13 = scmp.lt.u32.totalorder %s2239_s18, %s2904_s27 }
 0x2d9   : > { %p2241_p7 = pnand %p2240_p6, %p2447_p4 }
 0x2da   : > { %p2246_p12 = por %p2245_p11, %p2244_p10 }
 0x2db   : > { %p2242_p9 = pneg %p2241_p7 }
 0x2dc   : > { %p2248_p0 = por %p2247_p13, %p2246_p12 }
 0x2de   : > { %p2249_p1 = pnand %p2248_p0, %p2242_p9 }
 0x2e0   : > { %2252 = shalt.err (!%p2249_p1)
}
 0x2e1   : > { %2066 = dma.vmem_to_hbm [thread:$0]  (%p2447_p4), %s1553_s1, 128, %s2904_s27, %s1515_s20  }
 0x2e2   : > { %s2929_s25 = scalar_lea.hbm %s2991_s10, %s1847_s16  ;;  %s1566_s2 = sshll.u32 %s2755_s14, 4  ;;  %s1567_s2 = int_to_ptr.vmem [resolvable:$true] %s1566_s2 }
 0x2e3   : > { %s1520_s18 = scalar_lea.sflag [#allocation5], %s2749_s28  ;;  %s2253_s3 = scalar_lea.vmem %s1567_s2, 128 }
 0x2e4   : > { %p2254_p2 = scmp.ne.s32.totalorder %s1567_s2, %s2253_s3  ;;  %s2341_s30 = smov [#allocation4]  }
 0x2e5   : > { %s2257_s19 = sshll.u32 %s2341_s30, 4  ;;  %s2258_s19 = int_to_ptr.vmem [resolvable:$false] %s2257_s19 }
 0x2e6   : > { %p2255_p3 = pnand %p2254_p2, %p2447_p4  ;;  %s2259_s4 = scalar_lea.vmem %s2258_s19, 256 }
 0x2e7   : > { %p2260_p6 = scmp.lt.s32.totalorder %s1567_s2, %s2258_s19  ;;  %p2261_p7 = scmp.lt.s32.totalorder %s2259_s4, %s2253_s3 }
 0x2e8   : > { %p2256_p5 = pneg %p2255_p3 }
 0x2e9   : > { %p2262_p9 = por %p2261_p7, %p2260_p6 }
 0x2eb   : > { %p2263_p10 = pnand %p2262_p9, %p2256_p5 }
 0x2ed   : > { %2266 = shalt.err (!%p2263_p10)
}
 0x2ee   : > { %s2267_s24 = scalar_lea.hbm %s2929_s25, 128  ;;  %s2271_s16 = scalar_lea.hbm %s2991_s10, 256 }
 0x2ef   : > { %p2268_p11 = scmp.ne.s32.totalorder %s2929_s25, %s2267_s24  ;;  %p2272_p0 = scmp.lt.u32.totalorder %s2929_s25, %s2991_s10 }
 0x2f0   : > { %p2273_p1 = scmp.lt.u32.totalorder %s2271_s16, %s2267_s24  ;;  %p2275_p3 = scmp.lt.u32.totalorder %s2267_s24, %s2929_s25 }
 0x2f1   : > { %p2269_p12 = pnand %p2268_p11, %p2447_p4 }
 0x2f2   : > { %p2274_p2 = por %p2273_p1, %p2272_p0 }
 0x2f3   : > { %p2270_p13 = pneg %p2269_p12 }
 0x2f4   : > { %p2276_p5 = por %p2275_p3, %p2274_p2 }
 0x2f6   : > { %p2277_p6 = pnand %p2276_p5, %p2270_p13 }
 0x2f8   : > { %2280 = shalt.err (!%p2277_p6)
}
 0x2f9   : > { %2067 = dma.vmem_to_hbm [thread:$0]  (%p2447_p4), %s1567_s2, 128, %s2929_s25, %s1520_s18  }
 0x2fa   : > { %s3012_s4 = smul.u32 24, %s2500_s17 }
 0x2fc   : > { %s496_s29 = scalar_lea.vmem %s2993_s12, %s3012_s4 }
 0x3a3   : > { %v1424_v1 = vpop.f32.mrb[10].mxu1 }
 0x3a4   : > { %2219 = vrcp.f32 %v1424_v1  ;;  %v1426_v13 = vpop.f32.mrb[11].mxu1 }
 0x3a5   : > { %2221 = vrcp.f32 %v1426_v13 }
 0x3a7   : > { %v1495_v10 = vpop.f32.mrb[12].mxu1 }
 0x3a8   : > { %2223 = vrcp.f32 %v1495_v10  ;;  %v2010_v11 = vpop.f32.mrb[13].mxu1 }
 0x3ae   : > { %v2220_v12 = vpop.eup %2219 }
 0x3af   : > { %v2222_v14 = vpop.eup %2221  ;;  %v1500_v15 = vmul.f32 %v2220_v12, %v2863_v55 }
 0x3b0   : > { %v1502_v16 = vmul.f32 %v2222_v14, %v2865_v56 }
 0x3b1   : > { %1511 = vst [vmem:[%s496_s29] sm:$0xff] %v1500_v15 }
 0x3b2   : > { %v2224_v17 = vpop.eup %2223  ;;  %1512 = vst [vmem:[%s496_s29 + $0x8] sm:$0xff] %v1502_v16 }
 0x3b3   : > { %v1504_v18 = vmul.f32 %v2224_v17, %v2867_v57 }
 0x3b5   : > { %1513 = vst.msk [vmem:[%s496_s29 + $0x10] sm:$0xff] %vm1148_vm3, %v1504_v18 }
 0x3b6 PF: > { %p2077_p4 = scmp.ge.s32.totalorder %s2335_s26, 2  ;;  %s1584_s13 = sand.u32 1, %s2315_s21  }
 0x3b7   : > { %s1585_s17 = scalar_lea.sflag [#allocation3], %s1584_s13 }
 0x3b8   : > { %p2071_p7 = pnand %p2077_p4, %p2454_p8 }
 0x3ba   : > { %2306 = dma.done.wait (!%p2071_p7), %s1585_s17, 128  }
 0x3bb   : > { %2308 = vsyncadd (!%p2071_p7), %s1585_s17, 4294967168  ;;  %s1594_s25 = scalar_lea.sflag [#allocation5], %s1584_s13 }
 0x3bc   : > { %2310 = dma.done.wait (!%p2071_p7), %s1594_s25, 128  }
 0x3bd   : > { %2312 = vsyncadd (!%p2071_p7), %s1594_s25, 4294967168  ;;  %s29_s26 = sadd.s32 1, %s2335_s26   ;;  %s3013_s2 = sld [smem:[#allocation10_spill]] }
 0x3be   : > { %p26_p9 = scmp.ge.s32.totalorder %s29_s26, 4   ;;  %s3014_s24 = sld [smem:[#allocation8_spill]] }
 0x3bf   : > { %s3015_s25 = sld [smem:[#allocation9_spill]]  ;;  %s3016_s21 = smov %s2319_s22 }
 0x3c0   : > { %s3017_s22 = smov %s2323_s23  ;;  %28 = sbr.rel (!%p26_p9) target bundleno = 12 (0xc), region = 132 }
 0x3c3   : > { %s3018_s23 = smov %s3013_s2 }
 0x3c7   :  { %1623 = vsyncpa [#allocation3], 1 }
 0x3c8   :  { %1625 = vsyncpa [#allocation3 + $0x1], 1 }
 0x3c9   :  { %1626 = vsyncpa [#allocation5], 1 }
 0x3ca   :  { %1628 = vsyncpa [#allocation5 + $0x1], 1 }

</bundles_post_ra>
